<compile_context>
chip_gen: v7x
topology: tpu7x:2x2x1
jax: 0.10.0
libtpu: 0.0.40
codegen_flags: <defaults>
</compile_context>

<pallas_src>
import functools

import jax
import jax.numpy as jnp
from jax.experimental import pallas as pl
from jax.experimental.pallas import tpu as pltpu


def _issue_tile_gathers(ids_ref, tok_hbm, buf, sem, b, base, TS, V):
    """Start TS single-row DMAs tok_hbm[id[base+t]] -> buf[t]; all signal `sem`."""
    for t in range(TS):
        tok_id = ids_ref[b, base + t]
        tok_id = jnp.minimum(jnp.maximum(tok_id, 0), V - 1)  # clamp: see OOB contract
        pltpu.make_async_copy(
            tok_hbm.at[pl.ds(tok_id, 1), :],
            buf.at[pl.ds(t, 1), :],
            sem,
        ).start()


def _wait_tile_gathers(tok_hbm, buf, sem, TS):
    # Per-row waits on the shared per-slot semaphore: every wait descriptor has the
    # same byte count as every start, so TS waits exactly drain TS completions.
    for t in range(TS):
        pltpu.make_async_copy(
            tok_hbm.at[pl.ds(0, 1), :],
            buf.at[pl.ds(t, 1), :],
            sem,
        ).wait()


def embedding_kernel(ids_ref, tok_hbm, pos_ref, gamma_ref, beta_ref, o_ref,
                     gather_buf, sems, *, eps):
    # ids_ref:    (B, S) int32 in SMEM (scalar prefetch)
    # tok_hbm:    (V, D) token table, left in HBM (memory_space=pl.ANY)
    # pos_ref:    (TS, D) VMEM -- positional rows for this sequence tile
    # gamma_ref:  (1, D) VMEM
    # beta_ref:   (1, D) VMEM
    # o_ref:      (1, TS, D) float32 output tile
    # gather_buf: (2, TS, D) VMEM scratch (double-buffered gather destination)
    # sems:       (2,) DMA semaphores (one per slot)
    b = pl.program_id(0)
    si = pl.program_id(1)
    n_si = pl.num_programs(1)
    _, TS, D = gather_buf.shape
    V = tok_hbm.shape[0]

    slot = si & 1
    nslot = 1 - slot

    # Prime: at the first sequence tile of each batch row, fetch the current tile.
    @pl.when(si == 0)
    def _():
        _issue_tile_gathers(ids_ref, tok_hbm, gather_buf.at[0], sems.at[0],
                            b, 0, TS, V)

    # Prefetch the NEXT tile's rows into the other slot while this tile is consumed.
    @pl.when(si + 1 < n_si)
    def _():
        _issue_tile_gathers(ids_ref, tok_hbm, gather_buf.at[nslot], sems.at[nslot],
                            b, (si + 1) * TS, TS, V)

    # Wait for the current tile's rows to land (issued at the previous step / prime).
    _wait_tile_gathers(tok_hbm, gather_buf.at[slot], sems.at[slot], TS)

    # tok_embed + pos_embed, then LayerNorm over D (f32 math throughout; matches
    # PyTorch numerics and keeps the VPU/EUP path f32-only-safe on v5e).
    emb = gather_buf[slot].astype(jnp.float32) + pos_ref[...].astype(jnp.float32)

    mean = jnp.mean(emb, axis=-1, keepdims=True)
    var = jnp.mean(jnp.square(emb - mean), axis=-1, keepdims=True)   # biased variance
    normed = (emb - mean) * jax.lax.rsqrt(var + eps)
    out = normed * gamma_ref[...].astype(jnp.float32) + beta_ref[...].astype(jnp.float32)

    o_ref[0, :, :] = out.astype(o_ref.dtype)


def _pick_seq_tile(S):
    # Largest multiple-of-8 divisor of S, capped at 128 tokens per grid step
    # (caps the number of unrolled per-row DMAs and the scratch footprint).
    for cand in (128, 64, 32, 16, 8):
        if S % cand == 0:
            return cand
    return S  # S < 8 or odd S: single full-sequence tile (block == full dim)


def embedding_forward(x, tok_table, pos_table, gamma, beta, *, seq_tile=None, eps=1e-5):
    B, S = x.shape
    V, D = tok_table.shape
    L = pos_table.shape[0]
    assert S <= L, "seq_len must not exceed max_len"

    if seq_tile is None:
        seq_tile = _pick_seq_tile(S)
    assert S % seq_tile == 0, "seq_tile must divide seq_len"
    num_seq_tiles = S // seq_tile

    x = x.astype(jnp.int32)
    pos_used = pos_table[:S]           # positions are 0..S-1 for every batch row
    gamma2 = gamma.reshape(1, D)
    beta2 = beta.reshape(1, D)

    kernel = functools.partial(embedding_kernel, eps=eps)

    return pl.pallas_call(
        kernel,
        out_shape=jax.ShapeDtypeStruct((B, S, D), jnp.float32),
        grid_spec=pltpu.PrefetchScalarGridSpec(
            num_scalar_prefetch=1,                 # token ids -> SMEM
            grid=(B, num_seq_tiles),
            in_specs=[
                pl.BlockSpec(memory_space=pl.ANY),                          # tok table stays in HBM
                pl.BlockSpec((seq_tile, D), lambda b, si, ids: (si, 0)),    # pos rows for this tile
                pl.BlockSpec((1, D), lambda b, si, ids: (0, 0)),            # gamma
                pl.BlockSpec((1, D), lambda b, si, ids: (0, 0)),            # beta
            ],
            out_specs=pl.BlockSpec((1, seq_tile, D), lambda b, si, ids: (b, si, 0)),
            scratch_shapes=[
                pltpu.VMEM((2, seq_tile, D), tok_table.dtype),   # double-buffered gather dst
                pltpu.SemaphoreType.DMA((2,)),                   # one sem per slot
            ],
        ),
        compiler_params=pltpu.CompilerParams(
            # batch axis can be megacore-sharded; sequence axis must stay sequential
            # because the gather double-buffer carries state across si steps.
            dimension_semantics=("parallel", "arbitrary"),
        ),
    )(x, tok_table, pos_used, gamma2, beta2)


def reference_forward(x, tok_table, pos_table, gamma, beta):
    # Plain-JAX reference mirroring the PyTorch module.
    B, S = x.shape
    pos = jnp.arange(S, dtype=jnp.int32)
    emb = pos_table[pos][None, :, :] + tok_table[x]          # (B, S, D)
    mean = jnp.mean(emb, axis=-1, keepdims=True)
    var = jnp.mean(jnp.square(emb - mean), axis=-1, keepdims=True)
    normed = (emb - mean) / jnp.sqrt(var + 1e-5)
    return normed * gamma + beta


if __name__ == "__main__":
    # Small, deterministic shapes consistent with the module's forward.
    vocab_size = 32
    max_len = 16
    d_model = 128      # lane-dense output tiles (last dim = 128)
    batch = 2
    seq_len = 16

    key = jax.random.PRNGKey(0)
    k_tok, k_pos, k_x = jax.random.split(key, 3)

    # nn.Embedding default init: N(0, 1); nn.LayerNorm default init: gamma=1, beta=0.
    tok_table = jax.random.normal(k_tok, (vocab_size, d_model), dtype=jnp.float32)
    pos_table = jax.random.normal(k_pos, (max_len, d_model), dtype=jnp.float32)
    gamma = jnp.ones((d_model,), dtype=jnp.float32)
    beta = jnp.zeros((d_model,), dtype=jnp.float32)

    x = jax.random.randint(k_x, (batch, seq_len), 0, vocab_size, dtype=jnp.int32)

    ref = reference_forward(x, tok_table, pos_table, gamma, beta)

    # Exercise both the single-tile path (seq_tile=None -> 16) and the multi-tile
    # double-buffered gather path (seq_tile=8 -> 2 tiles per batch row).
    for st in (None, 8):
        out = embedding_forward(x, tok_table, pos_table, gamma, beta, seq_tile=st)
        out = jax.block_until_ready(out)
        assert out.shape == (batch, seq_len, d_model)
        assert jnp.allclose(out, ref, atol=1e-4, rtol=1e-4)

    print("KERNEL_OK")
</pallas_src>

<mosaic_0001>
module attributes {stable_mosaic.version = 11 : i64} {
  func.func @embedding_kernel(%arg0: i32, %arg1: i32, %arg2: memref<2x16xi32, #tpu.memory_space<smem>>, %arg3: memref<32x128xf32, #tpu.memory_space<any>>, %arg4: memref<16x128xf32, #tpu.memory_space<vmem>>, %arg5: memref<1x128xf32, #tpu.memory_space<vmem>>, %arg6: memref<1x128xf32, #tpu.memory_space<vmem>>, %arg7: memref<1x16x128xf32, #tpu.memory_space<vmem>>, %arg8: memref<2x16x128xf32, #tpu.memory_space<vmem>>, %arg9: memref<2x!tpu.dma_semaphore, #tpu.memory_space<semaphore_mem>>) attributes {dimension_semantics = [#tpu.dimension_semantics<parallel>, #tpu.dimension_semantics<arbitrary>], iteration_bounds = array<i64: 2, 1>, scalar_prefetch = 1 : i64, scratch_operands = 2 : i64, tpu.core_type = #tpu.core_type<tc>, window_params = [{}, {transform_indices = @transform_1, window_bounds = array<i64: 16, 128>}, {pipeline_mode = #tpu.pipeline_mode<synchronous>, transform_indices = @transform_2, window_bounds = array<i64: 1, 128>}, {pipeline_mode = #tpu.pipeline_mode<synchronous>, transform_indices = @transform_3, window_bounds = array<i64: 1, 128>}, {transform_indices = @transform_4, window_bounds = array<i64: 1, 16, 128>}]} {
    %c1_i32 = arith.constant 1 : i32
    %0 = arith.andi %arg1, %c1_i32 : i32
    %c1_i32_0 = arith.constant 1 : i32
    %1 = arith.subi %c1_i32_0, %0 : i32
    %c0_i32 = arith.constant 0 : i32
    %2 = arith.cmpi eq, %arg1, %c0_i32 : i32
    %3 = arith.extui %2 : i1 to i32
    %c0_i32_1 = arith.constant 0 : i32
    %4 = arith.cmpi ne, %3, %c0_i32_1 : i32
    scf.if %4 {
      %137 = arith.index_cast %arg0 : i32 to index
      %c0_101 = arith.constant 0 : index
      %138 = memref.load %arg2[%137, %c0_101] : memref<2x16xi32, #tpu.memory_space<smem>>
      %c0_i32_102 = arith.constant 0 : i32
      %139 = arith.maxsi %138, %c0_i32_102 : i32
      %c31_i32 = arith.constant 31 : i32
      %140 = arith.minsi %139, %c31_i32 : i32
      %c0_i32_103 = arith.constant 0 : i32
      %c0_i32_104 = arith.constant 0 : i32
      %c0_i32_105 = arith.constant 0 : i32
      %141 = tpu.memref_slice %arg3[%140, %c0_i32_105] : memref<32x128xf32, #tpu.memory_space<any>> -> memref<1x128xf32, #tpu.memory_space<any>>
      %c0_i32_106 = arith.constant 0 : i32
      %c0_i32_107 = arith.constant 0 : i32
      %142 = tpu.memref_slice %arg8[%c0_i32_103, %c0_i32_106, %c0_i32_107] : memref<2x16x128xf32, #tpu.memory_space<vmem>> -> memref<1x16x128xf32, #tpu.memory_space<vmem>>
      %143 = tpu.memref_squeeze %142 : memref<1x16x128xf32, #tpu.memory_space<vmem>> -> memref<16x128xf32, #tpu.memory_space<vmem>>
      %c0_i32_108 = arith.constant 0 : i32
      %c0_i32_109 = arith.constant 0 : i32
      %144 = tpu.memref_slice %143[%c0_i32_108, %c0_i32_109] : memref<16x128xf32, #tpu.memory_space<vmem>> -> memref<1x128xf32, #tpu.memory_space<vmem>>
      %145 = tpu.memref_slice %arg9[%c0_i32_104] : memref<2x!tpu.dma_semaphore, #tpu.memory_space<semaphore_mem>> -> memref<1x!tpu.dma_semaphore, #tpu.memory_space<semaphore_mem>>
      %146 = tpu.memref_squeeze %145 : memref<1x!tpu.dma_semaphore, #tpu.memory_space<semaphore_mem>> -> memref<!tpu.dma_semaphore, #tpu.memory_space<semaphore_mem>>
      tpu.enqueue_dma source(%141 : memref<1x128xf32, #tpu.memory_space<any>>) target(%144 : memref<1x128xf32, #tpu.memory_space<vmem>>) target_semaphore(%146 : memref<!tpu.dma_semaphore, #tpu.memory_space<semaphore_mem>>)
      %147 = arith.index_cast %arg0 : i32 to index
      %c1 = arith.constant 1 : index
      %148 = memref.load %arg2[%147, %c1] : memref<2x16xi32, #tpu.memory_space<smem>>
      %c0_i32_110 = arith.constant 0 : i32
      %149 = arith.maxsi %148, %c0_i32_110 : i32
      %c31_i32_111 = arith.constant 31 : i32
      %150 = arith.minsi %149, %c31_i32_111 : i32
      %c0_i32_112 = arith.constant 0 : i32
      %c0_i32_113 = arith.constant 0 : i32
      %c0_i32_114 = arith.constant 0 : i32
      %151 = tpu.memref_slice %arg3[%150, %c0_i32_114] : memref<32x128xf32, #tpu.memory_space<any>> -> memref<1x128xf32, #tpu.memory_space<any>>
      %c0_i32_115 = arith.constant 0 : i32
      %c0_i32_116 = arith.constant 0 : i32
      %152 = tpu.memref_slice %arg8[%c0_i32_112, %c0_i32_115, %c0_i32_116] : memref<2x16x128xf32, #tpu.memory_space<vmem>> -> memref<1x16x128xf32, #tpu.memory_space<vmem>>
      %153 = tpu.memref_squeeze %152 : memref<1x16x128xf32, #tpu.memory_space<vmem>> -> memref<16x128xf32, #tpu.memory_space<vmem>>
      %c1_i32_117 = arith.constant 1 : i32
      %c0_i32_118 = arith.constant 0 : i32
      %154 = tpu.memref_slice %153[%c1_i32_117, %c0_i32_118] : memref<16x128xf32, #tpu.memory_space<vmem>> -> memref<1x128xf32, #tpu.memory_space<vmem>>
      %155 = tpu.memref_slice %arg9[%c0_i32_113] : memref<2x!tpu.dma_semaphore, #tpu.memory_space<semaphore_mem>> -> memref<1x!tpu.dma_semaphore, #tpu.memory_space<semaphore_mem>>
      %156 = tpu.memref_squeeze %155 : memref<1x!tpu.dma_semaphore, #tpu.memory_space<semaphore_mem>> -> memref<!tpu.dma_semaphore, #tpu.memory_space<semaphore_mem>>
      tpu.enqueue_dma source(%151 : memref<1x128xf32, #tpu.memory_space<any>>) target(%154 : memref<1x128xf32, #tpu.memory_space<vmem>>) target_semaphore(%156 : memref<!tpu.dma_semaphore, #tpu.memory_space<semaphore_mem>>)
      %157 = arith.index_cast %arg0 : i32 to index
      %c2 = arith.constant 2 : index
      %158 = memref.load %arg2[%157, %c2] : memref<2x16xi32, #tpu.memory_space<smem>>
      %c0_i32_119 = arith.constant 0 : i32
      %159 = arith.maxsi %158, %c0_i32_119 : i32
      %c31_i32_120 = arith.constant 31 : i32
      %160 = arith.minsi %159, %c31_i32_120 : i32
      %c0_i32_121 = arith.constant 0 : i32
      %c0_i32_122 = arith.constant 0 : i32
      %c0_i32_123 = arith.constant 0 : i32
      %161 = tpu.memref_slice %arg3[%160, %c0_i32_123] : memref<32x128xf32, #tpu.memory_space<any>> -> memref<1x128xf32, #tpu.memory_space<any>>
      %c0_i32_124 = arith.constant 0 : i32
      %c0_i32_125 = arith.constant 0 : i32
      %162 = tpu.memref_slice %arg8[%c0_i32_121, %c0_i32_124, %c0_i32_125] : memref<2x16x128xf32, #tpu.memory_space<vmem>> -> memref<1x16x128xf32, #tpu.memory_space<vmem>>
      %163 = tpu.memref_squeeze %162 : memref<1x16x128xf32, #tpu.memory_space<vmem>> -> memref<16x128xf32, #tpu.memory_space<vmem>>
      %c2_i32_126 = arith.constant 2 : i32
      %c0_i32_127 = arith.constant 0 : i32
      %164 = tpu.memref_slice %163[%c2_i32_126, %c0_i32_127] : memref<16x128xf32, #tpu.memory_space<vmem>> -> memref<1x128xf32, #tpu.memory_space<vmem>>
      %165 = tpu.memref_slice %arg9[%c0_i32_122] : memref<2x!tpu.dma_semaphore, #tpu.memory_space<semaphore_mem>> -> memref<1x!tpu.dma_semaphore, #tpu.memory_space<semaphore_mem>>
      %166 = tpu.memref_squeeze %165 : memref<1x!tpu.dma_semaphore, #tpu.memory_space<semaphore_mem>> -> memref<!tpu.dma_semaphore, #tpu.memory_space<semaphore_mem>>
      tpu.enqueue_dma source(%161 : memref<1x128xf32, #tpu.memory_space<any>>) target(%164 : memref<1x128xf32, #tpu.memory_space<vmem>>) target_semaphore(%166 : memref<!tpu.dma_semaphore, #tpu.memory_space<semaphore_mem>>)
      %167 = arith.index_cast %arg0 : i32 to index
      %c3 = arith.constant 3 : index
      %168 = memref.load %arg2[%167, %c3] : memref<2x16xi32, #tpu.memory_space<smem>>
      %c0_i32_128 = arith.constant 0 : i32
      %169 = arith.maxsi %168, %c0_i32_128 : i32
      %c31_i32_129 = arith.constant 31 : i32
      %170 = arith.minsi %169, %c31_i32_129 : i32
      %c0_i32_130 = arith.constant 0 : i32
      %c0_i32_131 = arith.constant 0 : i32
      %c0_i32_132 = arith.constant 0 : i32
      %171 = tpu.memref_slice %arg3[%170, %c0_i32_132] : memref<32x128xf32, #tpu.memory_space<any>> -> memref<1x128xf32, #tpu.memory_space<any>>
      %c0_i32_133 = arith.constant 0 : i32
      %c0_i32_134 = arith.constant 0 : i32
      %172 = tpu.memref_slice %arg8[%c0_i32_130, %c0_i32_133, %c0_i32_134] : memref<2x16x128xf32, #tpu.memory_space<vmem>> -> memref<1x16x128xf32, #tpu.memory_space<vmem>>
      %173 = tpu.memref_squeeze %172 : memref<1x16x128xf32, #tpu.memory_space<vmem>> -> memref<16x128xf32, #tpu.memory_space<vmem>>
      %c3_i32_135 = arith.constant 3 : i32
      %c0_i32_136 = arith.constant 0 : i32
      %174 = tpu.memref_slice %173[%c3_i32_135, %c0_i32_136] : memref<16x128xf32, #tpu.memory_space<vmem>> -> memref<1x128xf32, #tpu.memory_space<vmem>>
      %175 = tpu.memref_slice %arg9[%c0_i32_131] : memref<2x!tpu.dma_semaphore, #tpu.memory_space<semaphore_mem>> -> memref<1x!tpu.dma_semaphore, #tpu.memory_space<semaphore_mem>>
      %176 = tpu.memref_squeeze %175 : memref<1x!tpu.dma_semaphore, #tpu.memory_space<semaphore_mem>> -> memref<!tpu.dma_semaphore, #tpu.memory_space<semaphore_mem>>
      tpu.enqueue_dma source(%171 : memref<1x128xf32, #tpu.memory_space<any>>) target(%174 : memref<1x128xf32, #tpu.memory_space<vmem>>) target_semaphore(%176 : memref<!tpu.dma_semaphore, #tpu.memory_space<semaphore_mem>>)
      %177 = arith.index_cast %arg0 : i32 to index
      %c4 = arith.constant 4 : index
      %178 = memref.load %arg2[%177, %c4] : memref<2x16xi32, #tpu.memory_space<smem>>
      %c0_i32_137 = arith.constant 0 : i32
      %179 = arith.maxsi %178, %c0_i32_137 : i32
      %c31_i32_138 = arith.constant 31 : i32
      %180 = arith.minsi %179, %c31_i32_138 : i32
      %c0_i32_139 = arith.constant 0 : i32
      %c0_i32_140 = arith.constant 0 : i32
      %c0_i32_141 = arith.constant 0 : i32
      %181 = tpu.memref_slice %arg3[%180, %c0_i32_141] : memref<32x128xf32, #tpu.memory_space<any>> -> memref<1x128xf32, #tpu.memory_space<any>>
      %c0_i32_142 = arith.constant 0 : i32
      %c0_i32_143 = arith.constant 0 : i32
      %182 = tpu.memref_slice %arg8[%c0_i32_139, %c0_i32_142, %c0_i32_143] : memref<2x16x128xf32, #tpu.memory_space<vmem>> -> memref<1x16x128xf32, #tpu.memory_space<vmem>>
      %183 = tpu.memref_squeeze %182 : memref<1x16x128xf32, #tpu.memory_space<vmem>> -> memref<16x128xf32, #tpu.memory_space<vmem>>
      %c4_i32_144 = arith.constant 4 : i32
      %c0_i32_145 = arith.constant 0 : i32
      %184 = tpu.memref_slice %183[%c4_i32_144, %c0_i32_145] : memref<16x128xf32, #tpu.memory_space<vmem>> -> memref<1x128xf32, #tpu.memory_space<vmem>>
      %185 = tpu.memref_slice %arg9[%c0_i32_140] : memref<2x!tpu.dma_semaphore, #tpu.memory_space<semaphore_mem>> -> memref<1x!tpu.dma_semaphore, #tpu.memory_space<semaphore_mem>>
      %186 = tpu.memref_squeeze %185 : memref<1x!tpu.dma_semaphore, #tpu.memory_space<semaphore_mem>> -> memref<!tpu.dma_semaphore, #tpu.memory_space<semaphore_mem>>
      tpu.enqueue_dma source(%181 : memref<1x128xf32, #tpu.memory_space<any>>) target(%184 : memref<1x128xf32, #tpu.memory_space<vmem>>) target_semaphore(%186 : memref<!tpu.dma_semaphore, #tpu.memory_space<semaphore_mem>>)
      %187 = arith.index_cast %arg0 : i32 to index
      %c5 = arith.constant 5 : index
      %188 = memref.load %arg2[%187, %c5] : memref<2x16xi32, #tpu.memory_space<smem>>
      %c0_i32_146 = arith.constant 0 : i32
      %189 = arith.maxsi %188, %c0_i32_146 : i32
      %c31_i32_147 = arith.constant 31 : i32
      %190 = arith.minsi %189, %c31_i32_147 : i32
      %c0_i32_148 = arith.constant 0 : i32
      %c0_i32_149 = arith.constant 0 : i32
      %c0_i32_150 = arith.constant 0 : i32
      %191 = tpu.memref_slice %arg3[%190, %c0_i32_150] : memref<32x128xf32, #tpu.memory_space<any>> -> memref<1x128xf32, #tpu.memory_space<any>>
      %c0_i32_151 = arith.constant 0 : i32
      %c0_i32_152 = arith.constant 0 : i32
      %192 = tpu.memref_slice %arg8[%c0_i32_148, %c0_i32_151, %c0_i32_152] : memref<2x16x128xf32, #tpu.memory_space<vmem>> -> memref<1x16x128xf32, #tpu.memory_space<vmem>>
      %193 = tpu.memref_squeeze %192 : memref<1x16x128xf32, #tpu.memory_space<vmem>> -> memref<16x128xf32, #tpu.memory_space<vmem>>
      %c5_i32_153 = arith.constant 5 : i32
      %c0_i32_154 = arith.constant 0 : i32
      %194 = tpu.memref_slice %193[%c5_i32_153, %c0_i32_154] : memref<16x128xf32, #tpu.memory_space<vmem>> -> memref<1x128xf32, #tpu.memory_space<vmem>>
      %195 = tpu.memref_slice %arg9[%c0_i32_149] : memref<2x!tpu.dma_semaphore, #tpu.memory_space<semaphore_mem>> -> memref<1x!tpu.dma_semaphore, #tpu.memory_space<semaphore_mem>>
      %196 = tpu.memref_squeeze %195 : memref<1x!tpu.dma_semaphore, #tpu.memory_space<semaphore_mem>> -> memref<!tpu.dma_semaphore, #tpu.memory_space<semaphore_mem>>
      tpu.enqueue_dma source(%191 : memref<1x128xf32, #tpu.memory_space<any>>) target(%194 : memref<1x128xf32, #tpu.memory_space<vmem>>) target_semaphore(%196 : memref<!tpu.dma_semaphore, #tpu.memory_space<semaphore_mem>>)
      %197 = arith.index_cast %arg0 : i32 to index
      %c6 = arith.constant 6 : index
      %198 = memref.load %arg2[%197, %c6] : memref<2x16xi32, #tpu.memory_space<smem>>
      %c0_i32_155 = arith.constant 0 : i32
      %199 = arith.maxsi %198, %c0_i32_155 : i32
      %c31_i32_156 = arith.constant 31 : i32
      %200 = arith.minsi %199, %c31_i32_156 : i32
      %c0_i32_157 = arith.constant 0 : i32
      %c0_i32_158 = arith.constant 0 : i32
      %c0_i32_159 = arith.constant 0 : i32
      %201 = tpu.memref_slice %arg3[%200, %c0_i32_159] : memref<32x128xf32, #tpu.memory_space<any>> -> memref<1x128xf32, #tpu.memory_space<any>>
      %c0_i32_160 = arith.constant 0 : i32
      %c0_i32_161 = arith.constant 0 : i32
      %202 = tpu.memref_slice %arg8[%c0_i32_157, %c0_i32_160, %c0_i32_161] : memref<2x16x128xf32, #tpu.memory_space<vmem>> -> memref<1x16x128xf32, #tpu.memory_space<vmem>>
      %203 = tpu.memref_squeeze %202 : memref<1x16x128xf32, #tpu.memory_space<vmem>> -> memref<16x128xf32, #tpu.memory_space<vmem>>
      %c6_i32_162 = arith.constant 6 : i32
      %c0_i32_163 = arith.constant 0 : i32
      %204 = tpu.memref_slice %203[%c6_i32_162, %c0_i32_163] : memref<16x128xf32, #tpu.memory_space<vmem>> -> memref<1x128xf32, #tpu.memory_space<vmem>>
      %205 = tpu.memref_slice %arg9[%c0_i32_158] : memref<2x!tpu.dma_semaphore, #tpu.memory_space<semaphore_mem>> -> memref<1x!tpu.dma_semaphore, #tpu.memory_space<semaphore_mem>>
      %206 = tpu.memref_squeeze %205 : memref<1x!tpu.dma_semaphore, #tpu.memory_space<semaphore_mem>> -> memref<!tpu.dma_semaphore, #tpu.memory_space<semaphore_mem>>
      tpu.enqueue_dma source(%201 : memref<1x128xf32, #tpu.memory_space<any>>) target(%204 : memref<1x128xf32, #tpu.memory_space<vmem>>) target_semaphore(%206 : memref<!tpu.dma_semaphore, #tpu.memory_space<semaphore_mem>>)
      %207 = arith.index_cast %arg0 : i32 to index
      %c7 = arith.constant 7 : index
      %208 = memref.load %arg2[%207, %c7] : memref<2x16xi32, #tpu.memory_space<smem>>
      %c0_i32_164 = arith.constant 0 : i32
      %209 = arith.maxsi %208, %c0_i32_164 : i32
      %c31_i32_165 = arith.constant 31 : i32
      %210 = arith.minsi %209, %c31_i32_165 : i32
      %c0_i32_166 = arith.constant 0 : i32
      %c0_i32_167 = arith.constant 0 : i32
      %c0_i32_168 = arith.constant 0 : i32
      %211 = tpu.memref_slice %arg3[%210, %c0_i32_168] : memref<32x128xf32, #tpu.memory_space<any>> -> memref<1x128xf32, #tpu.memory_space<any>>
      %c0_i32_169 = arith.constant 0 : i32
      %c0_i32_170 = arith.constant 0 : i32
      %212 = tpu.memref_slice %arg8[%c0_i32_166, %c0_i32_169, %c0_i32_170] : memref<2x16x128xf32, #tpu.memory_space<vmem>> -> memref<1x16x128xf32, #tpu.memory_space<vmem>>
      %213 = tpu.memref_squeeze %212 : memref<1x16x128xf32, #tpu.memory_space<vmem>> -> memref<16x128xf32, #tpu.memory_space<vmem>>
      %c7_i32_171 = arith.constant 7 : i32
      %c0_i32_172 = arith.constant 0 : i32
      %214 = tpu.memref_slice %213[%c7_i32_171, %c0_i32_172] : memref<16x128xf32, #tpu.memory_space<vmem>> -> memref<1x128xf32, #tpu.memory_space<vmem>>
      %215 = tpu.memref_slice %arg9[%c0_i32_167] : memref<2x!tpu.dma_semaphore, #tpu.memory_space<semaphore_mem>> -> memref<1x!tpu.dma_semaphore, #tpu.memory_space<semaphore_mem>>
      %216 = tpu.memref_squeeze %215 : memref<1x!tpu.dma_semaphore, #tpu.memory_space<semaphore_mem>> -> memref<!tpu.dma_semaphore, #tpu.memory_space<semaphore_mem>>
      tpu.enqueue_dma source(%211 : memref<1x128xf32, #tpu.memory_space<any>>) target(%214 : memref<1x128xf32, #tpu.memory_space<vmem>>) target_semaphore(%216 : memref<!tpu.dma_semaphore, #tpu.memory_space<semaphore_mem>>)
      %217 = arith.index_cast %arg0 : i32 to index
      %c8 = arith.constant 8 : index
      %218 = memref.load %arg2[%217, %c8] : memref<2x16xi32, #tpu.memory_space<smem>>
      %c0_i32_173 = arith.constant 0 : i32
      %219 = arith.maxsi %218, %c0_i32_173 : i32
      %c31_i32_174 = arith.constant 31 : i32
      %220 = arith.minsi %219, %c31_i32_174 : i32
      %c0_i32_175 = arith.constant 0 : i32
      %c0_i32_176 = arith.constant 0 : i32
      %c0_i32_177 = arith.constant 0 : i32
      %221 = tpu.memref_slice %arg3[%220, %c0_i32_177] : memref<32x128xf32, #tpu.memory_space<any>> -> memref<1x128xf32, #tpu.memory_space<any>>
      %c0_i32_178 = arith.constant 0 : i32
      %c0_i32_179 = arith.constant 0 : i32
      %222 = tpu.memref_slice %arg8[%c0_i32_175, %c0_i32_178, %c0_i32_179] : memref<2x16x128xf32, #tpu.memory_space<vmem>> -> memref<1x16x128xf32, #tpu.memory_space<vmem>>
      %223 = tpu.memref_squeeze %222 : memref<1x16x128xf32, #tpu.memory_space<vmem>> -> memref<16x128xf32, #tpu.memory_space<vmem>>
      %c8_i32_180 = arith.constant 8 : i32
      %c0_i32_181 = arith.constant 0 : i32
      %224 = tpu.memref_slice %223[%c8_i32_180, %c0_i32_181] : memref<16x128xf32, #tpu.memory_space<vmem>> -> memref<1x128xf32, #tpu.memory_space<vmem>>
      %225 = tpu.memref_slice %arg9[%c0_i32_176] : memref<2x!tpu.dma_semaphore, #tpu.memory_space<semaphore_mem>> -> memref<1x!tpu.dma_semaphore, #tpu.memory_space<semaphore_mem>>
      %226 = tpu.memref_squeeze %225 : memref<1x!tpu.dma_semaphore, #tpu.memory_space<semaphore_mem>> -> memref<!tpu.dma_semaphore, #tpu.memory_space<semaphore_mem>>
      tpu.enqueue_dma source(%221 : memref<1x128xf32, #tpu.memory_space<any>>) target(%224 : memref<1x128xf32, #tpu.memory_space<vmem>>) target_semaphore(%226 : memref<!tpu.dma_semaphore, #tpu.memory_space<semaphore_mem>>)
      %227 = arith.index_cast %arg0 : i32 to index
      %c9 = arith.constant 9 : index
      %228 = memref.load %arg2[%227, %c9] : memref<2x16xi32, #tpu.memory_space<smem>>
      %c0_i32_182 = arith.constant 0 : i32
      %229 = arith.maxsi %228, %c0_i32_182 : i32
      %c31_i32_183 = arith.constant 31 : i32
      %230 = arith.minsi %229, %c31_i32_183 : i32
      %c0_i32_184 = arith.constant 0 : i32
      %c0_i32_185 = arith.constant 0 : i32
      %c0_i32_186 = arith.constant 0 : i32
      %231 = tpu.memref_slice %arg3[%230, %c0_i32_186] : memref<32x128xf32, #tpu.memory_space<any>> -> memref<1x128xf32, #tpu.memory_space<any>>
      %c0_i32_187 = arith.constant 0 : i32
      %c0_i32_188 = arith.constant 0 : i32
      %232 = tpu.memref_slice %arg8[%c0_i32_184, %c0_i32_187, %c0_i32_188] : memref<2x16x128xf32, #tpu.memory_space<vmem>> -> memref<1x16x128xf32, #tpu.memory_space<vmem>>
      %233 = tpu.memref_squeeze %232 : memref<1x16x128xf32, #tpu.memory_space<vmem>> -> memref<16x128xf32, #tpu.memory_space<vmem>>
      %c9_i32_189 = arith.constant 9 : i32
      %c0_i32_190 = arith.constant 0 : i32
      %234 = tpu.memref_slice %233[%c9_i32_189, %c0_i32_190] : memref<16x128xf32, #tpu.memory_space<vmem>> -> memref<1x128xf32, #tpu.memory_space<vmem>>
      %235 = tpu.memref_slice %arg9[%c0_i32_185] : memref<2x!tpu.dma_semaphore, #tpu.memory_space<semaphore_mem>> -> memref<1x!tpu.dma_semaphore, #tpu.memory_space<semaphore_mem>>
      %236 = tpu.memref_squeeze %235 : memref<1x!tpu.dma_semaphore, #tpu.memory_space<semaphore_mem>> -> memref<!tpu.dma_semaphore, #tpu.memory_space<semaphore_mem>>
      tpu.enqueue_dma source(%231 : memref<1x128xf32, #tpu.memory_space<any>>) target(%234 : memref<1x128xf32, #tpu.memory_space<vmem>>) target_semaphore(%236 : memref<!tpu.dma_semaphore, #tpu.memory_space<semaphore_mem>>)
      %237 = arith.index_cast %arg0 : i32 to index
      %c10 = arith.constant 10 : index
      %238 = memref.load %arg2[%237, %c10] : memref<2x16xi32, #tpu.memory_space<smem>>
      %c0_i32_191 = arith.constant 0 : i32
      %239 = arith.maxsi %238, %c0_i32_191 : i32
      %c31_i32_192 = arith.constant 31 : i32
      %240 = arith.minsi %239, %c31_i32_192 : i32
      %c0_i32_193 = arith.constant 0 : i32
      %c0_i32_194 = arith.constant 0 : i32
      %c0_i32_195 = arith.constant 0 : i32
      %241 = tpu.memref_slice %arg3[%240, %c0_i32_195] : memref<32x128xf32, #tpu.memory_space<any>> -> memref<1x128xf32, #tpu.memory_space<any>>
      %c0_i32_196 = arith.constant 0 : i32
      %c0_i32_197 = arith.constant 0 : i32
      %242 = tpu.memref_slice %arg8[%c0_i32_193, %c0_i32_196, %c0_i32_197] : memref<2x16x128xf32, #tpu.memory_space<vmem>> -> memref<1x16x128xf32, #tpu.memory_space<vmem>>
      %243 = tpu.memref_squeeze %242 : memref<1x16x128xf32, #tpu.memory_space<vmem>> -> memref<16x128xf32, #tpu.memory_space<vmem>>
      %c10_i32_198 = arith.constant 10 : i32
      %c0_i32_199 = arith.constant 0 : i32
      %244 = tpu.memref_slice %243[%c10_i32_198, %c0_i32_199] : memref<16x128xf32, #tpu.memory_space<vmem>> -> memref<1x128xf32, #tpu.memory_space<vmem>>
      %245 = tpu.memref_slice %arg9[%c0_i32_194] : memref<2x!tpu.dma_semaphore, #tpu.memory_space<semaphore_mem>> -> memref<1x!tpu.dma_semaphore, #tpu.memory_space<semaphore_mem>>
      %246 = tpu.memref_squeeze %245 : memref<1x!tpu.dma_semaphore, #tpu.memory_space<semaphore_mem>> -> memref<!tpu.dma_semaphore, #tpu.memory_space<semaphore_mem>>
      tpu.enqueue_dma source(%241 : memref<1x128xf32, #tpu.memory_space<any>>) target(%244 : memref<1x128xf32, #tpu.memory_space<vmem>>) target_semaphore(%246 : memref<!tpu.dma_semaphore, #tpu.memory_space<semaphore_mem>>)
      %247 = arith.index_cast %arg0 : i32 to index
      %c11 = arith.constant 11 : index
      %248 = memref.load %arg2[%247, %c11] : memref<2x16xi32, #tpu.memory_space<smem>>
      %c0_i32_200 = arith.constant 0 : i32
      %249 = arith.maxsi %248, %c0_i32_200 : i32
      %c31_i32_201 = arith.constant 31 : i32
      %250 = arith.minsi %249, %c31_i32_201 : i32
      %c0_i32_202 = arith.constant 0 : i32
      %c0_i32_203 = arith.constant 0 : i32
      %c0_i32_204 = arith.constant 0 : i32
      %251 = tpu.memref_slice %arg3[%250, %c0_i32_204] : memref<32x128xf32, #tpu.memory_space<any>> -> memref<1x128xf32, #tpu.memory_space<any>>
      %c0_i32_205 = arith.constant 0 : i32
      %c0_i32_206 = arith.constant 0 : i32
      %252 = tpu.memref_slice %arg8[%c0_i32_202, %c0_i32_205, %c0_i32_206] : memref<2x16x128xf32, #tpu.memory_space<vmem>> -> memref<1x16x128xf32, #tpu.memory_space<vmem>>
      %253 = tpu.memref_squeeze %252 : memref<1x16x128xf32, #tpu.memory_space<vmem>> -> memref<16x128xf32, #tpu.memory_space<vmem>>
      %c11_i32_207 = arith.constant 11 : i32
      %c0_i32_208 = arith.constant 0 : i32
      %254 = tpu.memref_slice %253[%c11_i32_207, %c0_i32_208] : memref<16x128xf32, #tpu.memory_space<vmem>> -> memref<1x128xf32, #tpu.memory_space<vmem>>
      %255 = tpu.memref_slice %arg9[%c0_i32_203] : memref<2x!tpu.dma_semaphore, #tpu.memory_space<semaphore_mem>> -> memref<1x!tpu.dma_semaphore, #tpu.memory_space<semaphore_mem>>
      %256 = tpu.memref_squeeze %255 : memref<1x!tpu.dma_semaphore, #tpu.memory_space<semaphore_mem>> -> memref<!tpu.dma_semaphore, #tpu.memory_space<semaphore_mem>>
      tpu.enqueue_dma source(%251 : memref<1x128xf32, #tpu.memory_space<any>>) target(%254 : memref<1x128xf32, #tpu.memory_space<vmem>>) target_semaphore(%256 : memref<!tpu.dma_semaphore, #tpu.memory_space<semaphore_mem>>)
      %257 = arith.index_cast %arg0 : i32 to index
      %c12 = arith.constant 12 : index
      %258 = memref.load %arg2[%257, %c12] : memref<2x16xi32, #tpu.memory_space<smem>>
      %c0_i32_209 = arith.constant 0 : i32
      %259 = arith.maxsi %258, %c0_i32_209 : i32
      %c31_i32_210 = arith.constant 31 : i32
      %260 = arith.minsi %259, %c31_i32_210 : i32
      %c0_i32_211 = arith.constant 0 : i32
      %c0_i32_212 = arith.constant 0 : i32
      %c0_i32_213 = arith.constant 0 : i32
      %261 = tpu.memref_slice %arg3[%260, %c0_i32_213] : memref<32x128xf32, #tpu.memory_space<any>> -> memref<1x128xf32, #tpu.memory_space<any>>
      %c0_i32_214 = arith.constant 0 : i32
      %c0_i32_215 = arith.constant 0 : i32
      %262 = tpu.memref_slice %arg8[%c0_i32_211, %c0_i32_214, %c0_i32_215] : memref<2x16x128xf32, #tpu.memory_space<vmem>> -> memref<1x16x128xf32, #tpu.memory_space<vmem>>
      %263 = tpu.memref_squeeze %262 : memref<1x16x128xf32, #tpu.memory_space<vmem>> -> memref<16x128xf32, #tpu.memory_space<vmem>>
      %c12_i32_216 = arith.constant 12 : i32
      %c0_i32_217 = arith.constant 0 : i32
      %264 = tpu.memref_slice %263[%c12_i32_216, %c0_i32_217] : memref<16x128xf32, #tpu.memory_space<vmem>> -> memref<1x128xf32, #tpu.memory_space<vmem>>
      %265 = tpu.memref_slice %arg9[%c0_i32_212] : memref<2x!tpu.dma_semaphore, #tpu.memory_space<semaphore_mem>> -> memref<1x!tpu.dma_semaphore, #tpu.memory_space<semaphore_mem>>
      %266 = tpu.memref_squeeze %265 : memref<1x!tpu.dma_semaphore, #tpu.memory_space<semaphore_mem>> -> memref<!tpu.dma_semaphore, #tpu.memory_space<semaphore_mem>>
      tpu.enqueue_dma source(%261 : memref<1x128xf32, #tpu.memory_space<any>>) target(%264 : memref<1x128xf32, #tpu.memory_space<vmem>>) target_semaphore(%266 : memref<!tpu.dma_semaphore, #tpu.memory_space<semaphore_mem>>)
      %267 = arith.index_cast %arg0 : i32 to index
      %c13 = arith.constant 13 : index
      %268 = memref.load %arg2[%267, %c13] : memref<2x16xi32, #tpu.memory_space<smem>>
      %c0_i32_218 = arith.constant 0 : i32
      %269 = arith.maxsi %268, %c0_i32_218 : i32
      %c31_i32_219 = arith.constant 31 : i32
      %270 = arith.minsi %269, %c31_i32_219 : i32
      %c0_i32_220 = arith.constant 0 : i32
      %c0_i32_221 = arith.constant 0 : i32
      %c0_i32_222 = arith.constant 0 : i32
      %271 = tpu.memref_slice %arg3[%270, %c0_i32_222] : memref<32x128xf32, #tpu.memory_space<any>> -> memref<1x128xf32, #tpu.memory_space<any>>
      %c0_i32_223 = arith.constant 0 : i32
      %c0_i32_224 = arith.constant 0 : i32
      %272 = tpu.memref_slice %arg8[%c0_i32_220, %c0_i32_223, %c0_i32_224] : memref<2x16x128xf32, #tpu.memory_space<vmem>> -> memref<1x16x128xf32, #tpu.memory_space<vmem>>
      %273 = tpu.memref_squeeze %272 : memref<1x16x128xf32, #tpu.memory_space<vmem>> -> memref<16x128xf32, #tpu.memory_space<vmem>>
      %c13_i32_225 = arith.constant 13 : i32
      %c0_i32_226 = arith.constant 0 : i32
      %274 = tpu.memref_slice %273[%c13_i32_225, %c0_i32_226] : memref<16x128xf32, #tpu.memory_space<vmem>> -> memref<1x128xf32, #tpu.memory_space<vmem>>
      %275 = tpu.memref_slice %arg9[%c0_i32_221] : memref<2x!tpu.dma_semaphore, #tpu.memory_space<semaphore_mem>> -> memref<1x!tpu.dma_semaphore, #tpu.memory_space<semaphore_mem>>
      %276 = tpu.memref_squeeze %275 : memref<1x!tpu.dma_semaphore, #tpu.memory_space<semaphore_mem>> -> memref<!tpu.dma_semaphore, #tpu.memory_space<semaphore_mem>>
      tpu.enqueue_dma source(%271 : memref<1x128xf32, #tpu.memory_space<any>>) target(%274 : memref<1x128xf32, #tpu.memory_space<vmem>>) target_semaphore(%276 : memref<!tpu.dma_semaphore, #tpu.memory_space<semaphore_mem>>)
      %277 = arith.index_cast %arg0 : i32 to index
      %c14 = arith.constant 14 : index
      %278 = memref.load %arg2[%277, %c14] : memref<2x16xi32, #tpu.memory_space<smem>>
      %c0_i32_227 = arith.constant 0 : i32
      %279 = arith.maxsi %278, %c0_i32_227 : i32
      %c31_i32_228 = arith.constant 31 : i32
      %280 = arith.minsi %279, %c31_i32_228 : i32
      %c0_i32_229 = arith.constant 0 : i32
      %c0_i32_230 = arith.constant 0 : i32
      %c0_i32_231 = arith.constant 0 : i32
      %281 = tpu.memref_slice %arg3[%280, %c0_i32_231] : memref<32x128xf32, #tpu.memory_space<any>> -> memref<1x128xf32, #tpu.memory_space<any>>
      %c0_i32_232 = arith.constant 0 : i32
      %c0_i32_233 = arith.constant 0 : i32
      %282 = tpu.memref_slice %arg8[%c0_i32_229, %c0_i32_232, %c0_i32_233] : memref<2x16x128xf32, #tpu.memory_space<vmem>> -> memref<1x16x128xf32, #tpu.memory_space<vmem>>
      %283 = tpu.memref_squeeze %282 : memref<1x16x128xf32, #tpu.memory_space<vmem>> -> memref<16x128xf32, #tpu.memory_space<vmem>>
      %c14_i32_234 = arith.constant 14 : i32
      %c0_i32_235 = arith.constant 0 : i32
      %284 = tpu.memref_slice %283[%c14_i32_234, %c0_i32_235] : memref<16x128xf32, #tpu.memory_space<vmem>> -> memref<1x128xf32, #tpu.memory_space<vmem>>
      %285 = tpu.memref_slice %arg9[%c0_i32_230] : memref<2x!tpu.dma_semaphore, #tpu.memory_space<semaphore_mem>> -> memref<1x!tpu.dma_semaphore, #tpu.memory_space<semaphore_mem>>
      %286 = tpu.memref_squeeze %285 : memref<1x!tpu.dma_semaphore, #tpu.memory_space<semaphore_mem>> -> memref<!tpu.dma_semaphore, #tpu.memory_space<semaphore_mem>>
      tpu.enqueue_dma source(%281 : memref<1x128xf32, #tpu.memory_space<any>>) target(%284 : memref<1x128xf32, #tpu.memory_space<vmem>>) target_semaphore(%286 : memref<!tpu.dma_semaphore, #tpu.memory_space<semaphore_mem>>)
      %287 = arith.index_cast %arg0 : i32 to index
      %c15 = arith.constant 15 : index
      %288 = memref.load %arg2[%287, %c15] : memref<2x16xi32, #tpu.memory_space<smem>>
      %c0_i32_236 = arith.constant 0 : i32
      %289 = arith.maxsi %288, %c0_i32_236 : i32
      %c31_i32_237 = arith.constant 31 : i32
      %290 = arith.minsi %289, %c31_i32_237 : i32
      %c0_i32_238 = arith.constant 0 : i32
      %c0_i32_239 = arith.constant 0 : i32
      %c0_i32_240 = arith.constant 0 : i32
      %291 = tpu.memref_slice %arg3[%290, %c0_i32_240] : memref<32x128xf32, #tpu.memory_space<any>> -> memref<1x128xf32, #tpu.memory_space<any>>
      %c0_i32_241 = arith.constant 0 : i32
      %c0_i32_242 = arith.constant 0 : i32
      %292 = tpu.memref_slice %arg8[%c0_i32_238, %c0_i32_241, %c0_i32_242] : memref<2x16x128xf32, #tpu.memory_space<vmem>> -> memref<1x16x128xf32, #tpu.memory_space<vmem>>
      %293 = tpu.memref_squeeze %292 : memref<1x16x128xf32, #tpu.memory_space<vmem>> -> memref<16x128xf32, #tpu.memory_space<vmem>>
      %c15_i32_243 = arith.constant 15 : i32
      %c0_i32_244 = arith.constant 0 : i32
      %294 = tpu.memref_slice %293[%c15_i32_243, %c0_i32_244] : memref<16x128xf32, #tpu.memory_space<vmem>> -> memref<1x128xf32, #tpu.memory_space<vmem>>
      %295 = tpu.memref_slice %arg9[%c0_i32_239] : memref<2x!tpu.dma_semaphore, #tpu.memory_space<semaphore_mem>> -> memref<1x!tpu.dma_semaphore, #tpu.memory_space<semaphore_mem>>
      %296 = tpu.memref_squeeze %295 : memref<1x!tpu.dma_semaphore, #tpu.memory_space<semaphore_mem>> -> memref<!tpu.dma_semaphore, #tpu.memory_space<semaphore_mem>>
      tpu.enqueue_dma source(%291 : memref<1x128xf32, #tpu.memory_space<any>>) target(%294 : memref<1x128xf32, #tpu.memory_space<vmem>>) target_semaphore(%296 : memref<!tpu.dma_semaphore, #tpu.memory_space<semaphore_mem>>)
    } else {
    }
    %c1_i32_2 = arith.constant 1 : i32
    %5 = arith.addi %arg1, %c1_i32_2 : i32
    %c1_i32_3 = arith.constant 1 : i32
    %6 = arith.cmpi slt, %5, %c1_i32_3 : i32
    %7 = arith.extui %6 : i1 to i32
    %c0_i32_4 = arith.constant 0 : i32
    %8 = arith.cmpi ne, %7, %c0_i32_4 : i32
    scf.if %8 {
      %c1_i32_101 = arith.constant 1 : i32
      %137 = arith.addi %arg1, %c1_i32_101 : i32
      %c16_i32 = arith.constant 16 : i32
      %138 = arith.muli %137, %c16_i32 : i32
      %c0_i32_102 = arith.constant 0 : i32
      %139 = arith.addi %138, %c0_i32_102 : i32
      %140 = arith.index_cast %arg0 : i32 to index
      %141 = arith.index_cast %139 : i32 to index
      %142 = memref.load %arg2[%140, %141] : memref<2x16xi32, #tpu.memory_space<smem>>
      %c0_i32_103 = arith.constant 0 : i32
      %143 = arith.maxsi %142, %c0_i32_103 : i32
      %c31_i32 = arith.constant 31 : i32
      %144 = arith.minsi %143, %c31_i32 : i32
      %c0_i32_104 = arith.constant 0 : i32
      %145 = tpu.memref_slice %arg3[%144, %c0_i32_104] : memref<32x128xf32, #tpu.memory_space<any>> -> memref<1x128xf32, #tpu.memory_space<any>>
      %c0_i32_105 = arith.constant 0 : i32
      %c0_i32_106 = arith.constant 0 : i32
      %146 = tpu.memref_slice %arg8[%1, %c0_i32_105, %c0_i32_106] : memref<2x16x128xf32, #tpu.memory_space<vmem>> -> memref<1x16x128xf32, #tpu.memory_space<vmem>>
      %147 = tpu.memref_squeeze %146 : memref<1x16x128xf32, #tpu.memory_space<vmem>> -> memref<16x128xf32, #tpu.memory_space<vmem>>
      %c0_i32_107 = arith.constant 0 : i32
      %c0_i32_108 = arith.constant 0 : i32
      %148 = tpu.memref_slice %147[%c0_i32_107, %c0_i32_108] : memref<16x128xf32, #tpu.memory_space<vmem>> -> memref<1x128xf32, #tpu.memory_space<vmem>>
      %149 = tpu.memref_slice %arg9[%1] : memref<2x!tpu.dma_semaphore, #tpu.memory_space<semaphore_mem>> -> memref<1x!tpu.dma_semaphore, #tpu.memory_space<semaphore_mem>>
      %150 = tpu.memref_squeeze %149 : memref<1x!tpu.dma_semaphore, #tpu.memory_space<semaphore_mem>> -> memref<!tpu.dma_semaphore, #tpu.memory_space<semaphore_mem>>
      tpu.enqueue_dma source(%145 : memref<1x128xf32, #tpu.memory_space<any>>) target(%148 : memref<1x128xf32, #tpu.memory_space<vmem>>) target_semaphore(%150 : memref<!tpu.dma_semaphore, #tpu.memory_space<semaphore_mem>>)
      %c1_i32_109 = arith.constant 1 : i32
      %151 = arith.addi %138, %c1_i32_109 : i32
      %152 = arith.index_cast %arg0 : i32 to index
      %153 = arith.index_cast %151 : i32 to index
      %154 = memref.load %arg2[%152, %153] : memref<2x16xi32, #tpu.memory_space<smem>>
      %c0_i32_110 = arith.constant 0 : i32
      %155 = arith.maxsi %154, %c0_i32_110 : i32
      %c31_i32_111 = arith.constant 31 : i32
      %156 = arith.minsi %155, %c31_i32_111 : i32
      %c0_i32_112 = arith.constant 0 : i32
      %157 = tpu.memref_slice %arg3[%156, %c0_i32_112] : memref<32x128xf32, #tpu.memory_space<any>> -> memref<1x128xf32, #tpu.memory_space<any>>
      %c0_i32_113 = arith.constant 0 : i32
      %c0_i32_114 = arith.constant 0 : i32
      %158 = tpu.memref_slice %arg8[%1, %c0_i32_113, %c0_i32_114] : memref<2x16x128xf32, #tpu.memory_space<vmem>> -> memref<1x16x128xf32, #tpu.memory_space<vmem>>
      %159 = tpu.memref_squeeze %158 : memref<1x16x128xf32, #tpu.memory_space<vmem>> -> memref<16x128xf32, #tpu.memory_space<vmem>>
      %c1_i32_115 = arith.constant 1 : i32
      %c0_i32_116 = arith.constant 0 : i32
      %160 = tpu.memref_slice %159[%c1_i32_115, %c0_i32_116] : memref<16x128xf32, #tpu.memory_space<vmem>> -> memref<1x128xf32, #tpu.memory_space<vmem>>
      %161 = tpu.memref_slice %arg9[%1] : memref<2x!tpu.dma_semaphore, #tpu.memory_space<semaphore_mem>> -> memref<1x!tpu.dma_semaphore, #tpu.memory_space<semaphore_mem>>
      %162 = tpu.memref_squeeze %161 : memref<1x!tpu.dma_semaphore, #tpu.memory_space<semaphore_mem>> -> memref<!tpu.dma_semaphore, #tpu.memory_space<semaphore_mem>>
      tpu.enqueue_dma source(%157 : memref<1x128xf32, #tpu.memory_space<any>>) target(%160 : memref<1x128xf32, #tpu.memory_space<vmem>>) target_semaphore(%162 : memref<!tpu.dma_semaphore, #tpu.memory_space<semaphore_mem>>)
      %c2_i32_117 = arith.constant 2 : i32
      %163 = arith.addi %138, %c2_i32_117 : i32
      %164 = arith.index_cast %arg0 : i32 to index
      %165 = arith.index_cast %163 : i32 to index
      %166 = memref.load %arg2[%164, %165] : memref<2x16xi32, #tpu.memory_space<smem>>
      %c0_i32_118 = arith.constant 0 : i32
      %167 = arith.maxsi %166, %c0_i32_118 : i32
      %c31_i32_119 = arith.constant 31 : i32
      %168 = arith.minsi %167, %c31_i32_119 : i32
      %c0_i32_120 = arith.constant 0 : i32
      %169 = tpu.memref_slice %arg3[%168, %c0_i32_120] : memref<32x128xf32, #tpu.memory_space<any>> -> memref<1x128xf32, #tpu.memory_space<any>>
      %c0_i32_121 = arith.constant 0 : i32
      %c0_i32_122 = arith.constant 0 : i32
      %170 = tpu.memref_slice %arg8[%1, %c0_i32_121, %c0_i32_122] : memref<2x16x128xf32, #tpu.memory_space<vmem>> -> memref<1x16x128xf32, #tpu.memory_space<vmem>>
      %171 = tpu.memref_squeeze %170 : memref<1x16x128xf32, #tpu.memory_space<vmem>> -> memref<16x128xf32, #tpu.memory_space<vmem>>
      %c2_i32_123 = arith.constant 2 : i32
      %c0_i32_124 = arith.constant 0 : i32
      %172 = tpu.memref_slice %171[%c2_i32_123, %c0_i32_124] : memref<16x128xf32, #tpu.memory_space<vmem>> -> memref<1x128xf32, #tpu.memory_space<vmem>>
      %173 = tpu.memref_slice %arg9[%1] : memref<2x!tpu.dma_semaphore, #tpu.memory_space<semaphore_mem>> -> memref<1x!tpu.dma_semaphore, #tpu.memory_space<semaphore_mem>>
      %174 = tpu.memref_squeeze %173 : memref<1x!tpu.dma_semaphore, #tpu.memory_space<semaphore_mem>> -> memref<!tpu.dma_semaphore, #tpu.memory_space<semaphore_mem>>
      tpu.enqueue_dma source(%169 : memref<1x128xf32, #tpu.memory_space<any>>) target(%172 : memref<1x128xf32, #tpu.memory_space<vmem>>) target_semaphore(%174 : memref<!tpu.dma_semaphore, #tpu.memory_space<semaphore_mem>>)
      %c3_i32_125 = arith.constant 3 : i32
      %175 = arith.addi %138, %c3_i32_125 : i32
      %176 = arith.index_cast %arg0 : i32 to index
      %177 = arith.index_cast %175 : i32 to index
      %178 = memref.load %arg2[%176, %177] : memref<2x16xi32, #tpu.memory_space<smem>>
      %c0_i32_126 = arith.constant 0 : i32
      %179 = arith.maxsi %178, %c0_i32_126 : i32
      %c31_i32_127 = arith.constant 31 : i32
      %180 = arith.minsi %179, %c31_i32_127 : i32
      %c0_i32_128 = arith.constant 0 : i32
      %181 = tpu.memref_slice %arg3[%180, %c0_i32_128] : memref<32x128xf32, #tpu.memory_space<any>> -> memref<1x128xf32, #tpu.memory_space<any>>
      %c0_i32_129 = arith.constant 0 : i32
      %c0_i32_130 = arith.constant 0 : i32
      %182 = tpu.memref_slice %arg8[%1, %c0_i32_129, %c0_i32_130] : memref<2x16x128xf32, #tpu.memory_space<vmem>> -> memref<1x16x128xf32, #tpu.memory_space<vmem>>
      %183 = tpu.memref_squeeze %182 : memref<1x16x128xf32, #tpu.memory_space<vmem>> -> memref<16x128xf32, #tpu.memory_space<vmem>>
      %c3_i32_131 = arith.constant 3 : i32
      %c0_i32_132 = arith.constant 0 : i32
      %184 = tpu.memref_slice %183[%c3_i32_131, %c0_i32_132] : memref<16x128xf32, #tpu.memory_space<vmem>> -> memref<1x128xf32, #tpu.memory_space<vmem>>
      %185 = tpu.memref_slice %arg9[%1] : memref<2x!tpu.dma_semaphore, #tpu.memory_space<semaphore_mem>> -> memref<1x!tpu.dma_semaphore, #tpu.memory_space<semaphore_mem>>
      %186 = tpu.memref_squeeze %185 : memref<1x!tpu.dma_semaphore, #tpu.memory_space<semaphore_mem>> -> memref<!tpu.dma_semaphore, #tpu.memory_space<semaphore_mem>>
      tpu.enqueue_dma source(%181 : memref<1x128xf32, #tpu.memory_space<any>>) target(%184 : memref<1x128xf32, #tpu.memory_space<vmem>>) target_semaphore(%186 : memref<!tpu.dma_semaphore, #tpu.memory_space<semaphore_mem>>)
      %c4_i32_133 = arith.constant 4 : i32
      %187 = arith.addi %138, %c4_i32_133 : i32
      %188 = arith.index_cast %arg0 : i32 to index
      %189 = arith.index_cast %187 : i32 to index
      %190 = memref.load %arg2[%188, %189] : memref<2x16xi32, #tpu.memory_space<smem>>
      %c0_i32_134 = arith.constant 0 : i32
      %191 = arith.maxsi %190, %c0_i32_134 : i32
      %c31_i32_135 = arith.constant 31 : i32
      %192 = arith.minsi %191, %c31_i32_135 : i32
      %c0_i32_136 = arith.constant 0 : i32
      %193 = tpu.memref_slice %arg3[%192, %c0_i32_136] : memref<32x128xf32, #tpu.memory_space<any>> -> memref<1x128xf32, #tpu.memory_space<any>>
      %c0_i32_137 = arith.constant 0 : i32
      %c0_i32_138 = arith.constant 0 : i32
      %194 = tpu.memref_slice %arg8[%1, %c0_i32_137, %c0_i32_138] : memref<2x16x128xf32, #tpu.memory_space<vmem>> -> memref<1x16x128xf32, #tpu.memory_space<vmem>>
      %195 = tpu.memref_squeeze %194 : memref<1x16x128xf32, #tpu.memory_space<vmem>> -> memref<16x128xf32, #tpu.memory_space<vmem>>
      %c4_i32_139 = arith.constant 4 : i32
      %c0_i32_140 = arith.constant 0 : i32
      %196 = tpu.memref_slice %195[%c4_i32_139, %c0_i32_140] : memref<16x128xf32, #tpu.memory_space<vmem>> -> memref<1x128xf32, #tpu.memory_space<vmem>>
      %197 = tpu.memref_slice %arg9[%1] : memref<2x!tpu.dma_semaphore, #tpu.memory_space<semaphore_mem>> -> memref<1x!tpu.dma_semaphore, #tpu.memory_space<semaphore_mem>>
      %198 = tpu.memref_squeeze %197 : memref<1x!tpu.dma_semaphore, #tpu.memory_space<semaphore_mem>> -> memref<!tpu.dma_semaphore, #tpu.memory_space<semaphore_mem>>
      tpu.enqueue_dma source(%193 : memref<1x128xf32, #tpu.memory_space<any>>) target(%196 : memref<1x128xf32, #tpu.memory_space<vmem>>) target_semaphore(%198 : memref<!tpu.dma_semaphore, #tpu.memory_space<semaphore_mem>>)
      %c5_i32_141 = arith.constant 5 : i32
      %199 = arith.addi %138, %c5_i32_141 : i32
      %200 = arith.index_cast %arg0 : i32 to index
      %201 = arith.index_cast %199 : i32 to index
      %202 = memref.load %arg2[%200, %201] : memref<2x16xi32, #tpu.memory_space<smem>>
      %c0_i32_142 = arith.constant 0 : i32
      %203 = arith.maxsi %202, %c0_i32_142 : i32
      %c31_i32_143 = arith.constant 31 : i32
      %204 = arith.minsi %203, %c31_i32_143 : i32
      %c0_i32_144 = arith.constant 0 : i32
      %205 = tpu.memref_slice %arg3[%204, %c0_i32_144] : memref<32x128xf32, #tpu.memory_space<any>> -> memref<1x128xf32, #tpu.memory_space<any>>
      %c0_i32_145 = arith.constant 0 : i32
      %c0_i32_146 = arith.constant 0 : i32
      %206 = tpu.memref_slice %arg8[%1, %c0_i32_145, %c0_i32_146] : memref<2x16x128xf32, #tpu.memory_space<vmem>> -> memref<1x16x128xf32, #tpu.memory_space<vmem>>
      %207 = tpu.memref_squeeze %206 : memref<1x16x128xf32, #tpu.memory_space<vmem>> -> memref<16x128xf32, #tpu.memory_space<vmem>>
      %c5_i32_147 = arith.constant 5 : i32
      %c0_i32_148 = arith.constant 0 : i32
      %208 = tpu.memref_slice %207[%c5_i32_147, %c0_i32_148] : memref<16x128xf32, #tpu.memory_space<vmem>> -> memref<1x128xf32, #tpu.memory_space<vmem>>
      %209 = tpu.memref_slice %arg9[%1] : memref<2x!tpu.dma_semaphore, #tpu.memory_space<semaphore_mem>> -> memref<1x!tpu.dma_semaphore, #tpu.memory_space<semaphore_mem>>
      %210 = tpu.memref_squeeze %209 : memref<1x!tpu.dma_semaphore, #tpu.memory_space<semaphore_mem>> -> memref<!tpu.dma_semaphore, #tpu.memory_space<semaphore_mem>>
      tpu.enqueue_dma source(%205 : memref<1x128xf32, #tpu.memory_space<any>>) target(%208 : memref<1x128xf32, #tpu.memory_space<vmem>>) target_semaphore(%210 : memref<!tpu.dma_semaphore, #tpu.memory_space<semaphore_mem>>)
      %c6_i32_149 = arith.constant 6 : i32
      %211 = arith.addi %138, %c6_i32_149 : i32
      %212 = arith.index_cast %arg0 : i32 to index
      %213 = arith.index_cast %211 : i32 to index
      %214 = memref.load %arg2[%212, %213] : memref<2x16xi32, #tpu.memory_space<smem>>
      %c0_i32_150 = arith.constant 0 : i32
      %215 = arith.maxsi %214, %c0_i32_150 : i32
      %c31_i32_151 = arith.constant 31 : i32
      %216 = arith.minsi %215, %c31_i32_151 : i32
      %c0_i32_152 = arith.constant 0 : i32
      %217 = tpu.memref_slice %arg3[%216, %c0_i32_152] : memref<32x128xf32, #tpu.memory_space<any>> -> memref<1x128xf32, #tpu.memory_space<any>>
      %c0_i32_153 = arith.constant 0 : i32
      %c0_i32_154 = arith.constant 0 : i32
      %218 = tpu.memref_slice %arg8[%1, %c0_i32_153, %c0_i32_154] : memref<2x16x128xf32, #tpu.memory_space<vmem>> -> memref<1x16x128xf32, #tpu.memory_space<vmem>>
      %219 = tpu.memref_squeeze %218 : memref<1x16x128xf32, #tpu.memory_space<vmem>> -> memref<16x128xf32, #tpu.memory_space<vmem>>
      %c6_i32_155 = arith.constant 6 : i32
      %c0_i32_156 = arith.constant 0 : i32
      %220 = tpu.memref_slice %219[%c6_i32_155, %c0_i32_156] : memref<16x128xf32, #tpu.memory_space<vmem>> -> memref<1x128xf32, #tpu.memory_space<vmem>>
      %221 = tpu.memref_slice %arg9[%1] : memref<2x!tpu.dma_semaphore, #tpu.memory_space<semaphore_mem>> -> memref<1x!tpu.dma_semaphore, #tpu.memory_space<semaphore_mem>>
      %222 = tpu.memref_squeeze %221 : memref<1x!tpu.dma_semaphore, #tpu.memory_space<semaphore_mem>> -> memref<!tpu.dma_semaphore, #tpu.memory_space<semaphore_mem>>
      tpu.enqueue_dma source(%217 : memref<1x128xf32, #tpu.memory_space<any>>) target(%220 : memref<1x128xf32, #tpu.memory_space<vmem>>) target_semaphore(%222 : memref<!tpu.dma_semaphore, #tpu.memory_space<semaphore_mem>>)
      %c7_i32_157 = arith.constant 7 : i32
      %223 = arith.addi %138, %c7_i32_157 : i32
      %224 = arith.index_cast %arg0 : i32 to index
      %225 = arith.index_cast %223 : i32 to index
      %226 = memref.load %arg2[%224, %225] : memref<2x16xi32, #tpu.memory_space<smem>>
      %c0_i32_158 = arith.constant 0 : i32
      %227 = arith.maxsi %226, %c0_i32_158 : i32
      %c31_i32_159 = arith.constant 31 : i32
      %228 = arith.minsi %227, %c31_i32_159 : i32
      %c0_i32_160 = arith.constant 0 : i32
      %229 = tpu.memref_slice %arg3[%228, %c0_i32_160] : memref<32x128xf32, #tpu.memory_space<any>> -> memref<1x128xf32, #tpu.memory_space<any>>
      %c0_i32_161 = arith.constant 0 : i32
      %c0_i32_162 = arith.constant 0 : i32
      %230 = tpu.memref_slice %arg8[%1, %c0_i32_161, %c0_i32_162] : memref<2x16x128xf32, #tpu.memory_space<vmem>> -> memref<1x16x128xf32, #tpu.memory_space<vmem>>
      %231 = tpu.memref_squeeze %230 : memref<1x16x128xf32, #tpu.memory_space<vmem>> -> memref<16x128xf32, #tpu.memory_space<vmem>>
      %c7_i32_163 = arith.constant 7 : i32
      %c0_i32_164 = arith.constant 0 : i32
      %232 = tpu.memref_slice %231[%c7_i32_163, %c0_i32_164] : memref<16x128xf32, #tpu.memory_space<vmem>> -> memref<1x128xf32, #tpu.memory_space<vmem>>
      %233 = tpu.memref_slice %arg9[%1] : memref<2x!tpu.dma_semaphore, #tpu.memory_space<semaphore_mem>> -> memref<1x!tpu.dma_semaphore, #tpu.memory_space<semaphore_mem>>
      %234 = tpu.memref_squeeze %233 : memref<1x!tpu.dma_semaphore, #tpu.memory_space<semaphore_mem>> -> memref<!tpu.dma_semaphore, #tpu.memory_space<semaphore_mem>>
      tpu.enqueue_dma source(%229 : memref<1x128xf32, #tpu.memory_space<any>>) target(%232 : memref<1x128xf32, #tpu.memory_space<vmem>>) target_semaphore(%234 : memref<!tpu.dma_semaphore, #tpu.memory_space<semaphore_mem>>)
      %c8_i32_165 = arith.constant 8 : i32
      %235 = arith.addi %138, %c8_i32_165 : i32
      %236 = arith.index_cast %arg0 : i32 to index
      %237 = arith.index_cast %235 : i32 to index
      %238 = memref.load %arg2[%236, %237] : memref<2x16xi32, #tpu.memory_space<smem>>
      %c0_i32_166 = arith.constant 0 : i32
      %239 = arith.maxsi %238, %c0_i32_166 : i32
      %c31_i32_167 = arith.constant 31 : i32
      %240 = arith.minsi %239, %c31_i32_167 : i32
      %c0_i32_168 = arith.constant 0 : i32
      %241 = tpu.memref_slice %arg3[%240, %c0_i32_168] : memref<32x128xf32, #tpu.memory_space<any>> -> memref<1x128xf32, #tpu.memory_space<any>>
      %c0_i32_169 = arith.constant 0 : i32
      %c0_i32_170 = arith.constant 0 : i32
      %242 = tpu.memref_slice %arg8[%1, %c0_i32_169, %c0_i32_170] : memref<2x16x128xf32, #tpu.memory_space<vmem>> -> memref<1x16x128xf32, #tpu.memory_space<vmem>>
      %243 = tpu.memref_squeeze %242 : memref<1x16x128xf32, #tpu.memory_space<vmem>> -> memref<16x128xf32, #tpu.memory_space<vmem>>
      %c8_i32_171 = arith.constant 8 : i32
      %c0_i32_172 = arith.constant 0 : i32
      %244 = tpu.memref_slice %243[%c8_i32_171, %c0_i32_172] : memref<16x128xf32, #tpu.memory_space<vmem>> -> memref<1x128xf32, #tpu.memory_space<vmem>>
      %245 = tpu.memref_slice %arg9[%1] : memref<2x!tpu.dma_semaphore, #tpu.memory_space<semaphore_mem>> -> memref<1x!tpu.dma_semaphore, #tpu.memory_space<semaphore_mem>>
      %246 = tpu.memref_squeeze %245 : memref<1x!tpu.dma_semaphore, #tpu.memory_space<semaphore_mem>> -> memref<!tpu.dma_semaphore, #tpu.memory_space<semaphore_mem>>
      tpu.enqueue_dma source(%241 : memref<1x128xf32, #tpu.memory_space<any>>) target(%244 : memref<1x128xf32, #tpu.memory_space<vmem>>) target_semaphore(%246 : memref<!tpu.dma_semaphore, #tpu.memory_space<semaphore_mem>>)
      %c9_i32_173 = arith.constant 9 : i32
      %247 = arith.addi %138, %c9_i32_173 : i32
      %248 = arith.index_cast %arg0 : i32 to index
      %249 = arith.index_cast %247 : i32 to index
      %250 = memref.load %arg2[%248, %249] : memref<2x16xi32, #tpu.memory_space<smem>>
      %c0_i32_174 = arith.constant 0 : i32
      %251 = arith.maxsi %250, %c0_i32_174 : i32
      %c31_i32_175 = arith.constant 31 : i32
      %252 = arith.minsi %251, %c31_i32_175 : i32
      %c0_i32_176 = arith.constant 0 : i32
      %253 = tpu.memref_slice %arg3[%252, %c0_i32_176] : memref<32x128xf32, #tpu.memory_space<any>> -> memref<1x128xf32, #tpu.memory_space<any>>
      %c0_i32_177 = arith.constant 0 : i32
      %c0_i32_178 = arith.constant 0 : i32
      %254 = tpu.memref_slice %arg8[%1, %c0_i32_177, %c0_i32_178] : memref<2x16x128xf32, #tpu.memory_space<vmem>> -> memref<1x16x128xf32, #tpu.memory_space<vmem>>
      %255 = tpu.memref_squeeze %254 : memref<1x16x128xf32, #tpu.memory_space<vmem>> -> memref<16x128xf32, #tpu.memory_space<vmem>>
      %c9_i32_179 = arith.constant 9 : i32
      %c0_i32_180 = arith.constant 0 : i32
      %256 = tpu.memref_slice %255[%c9_i32_179, %c0_i32_180] : memref<16x128xf32, #tpu.memory_space<vmem>> -> memref<1x128xf32, #tpu.memory_space<vmem>>
      %257 = tpu.memref_slice %arg9[%1] : memref<2x!tpu.dma_semaphore, #tpu.memory_space<semaphore_mem>> -> memref<1x!tpu.dma_semaphore, #tpu.memory_space<semaphore_mem>>
      %258 = tpu.memref_squeeze %257 : memref<1x!tpu.dma_semaphore, #tpu.memory_space<semaphore_mem>> -> memref<!tpu.dma_semaphore, #tpu.memory_space<semaphore_mem>>
      tpu.enqueue_dma source(%253 : memref<1x128xf32, #tpu.memory_space<any>>) target(%256 : memref<1x128xf32, #tpu.memory_space<vmem>>) target_semaphore(%258 : memref<!tpu.dma_semaphore, #tpu.memory_space<semaphore_mem>>)
      %c10_i32_181 = arith.constant 10 : i32
      %259 = arith.addi %138, %c10_i32_181 : i32
      %260 = arith.index_cast %arg0 : i32 to index
      %261 = arith.index_cast %259 : i32 to index
      %262 = memref.load %arg2[%260, %261] : memref<2x16xi32, #tpu.memory_space<smem>>
      %c0_i32_182 = arith.constant 0 : i32
      %263 = arith.maxsi %262, %c0_i32_182 : i32
      %c31_i32_183 = arith.constant 31 : i32
      %264 = arith.minsi %263, %c31_i32_183 : i32
      %c0_i32_184 = arith.constant 0 : i32
      %265 = tpu.memref_slice %arg3[%264, %c0_i32_184] : memref<32x128xf32, #tpu.memory_space<any>> -> memref<1x128xf32, #tpu.memory_space<any>>
      %c0_i32_185 = arith.constant 0 : i32
      %c0_i32_186 = arith.constant 0 : i32
      %266 = tpu.memref_slice %arg8[%1, %c0_i32_185, %c0_i32_186] : memref<2x16x128xf32, #tpu.memory_space<vmem>> -> memref<1x16x128xf32, #tpu.memory_space<vmem>>
      %267 = tpu.memref_squeeze %266 : memref<1x16x128xf32, #tpu.memory_space<vmem>> -> memref<16x128xf32, #tpu.memory_space<vmem>>
      %c10_i32_187 = arith.constant 10 : i32
      %c0_i32_188 = arith.constant 0 : i32
      %268 = tpu.memref_slice %267[%c10_i32_187, %c0_i32_188] : memref<16x128xf32, #tpu.memory_space<vmem>> -> memref<1x128xf32, #tpu.memory_space<vmem>>
      %269 = tpu.memref_slice %arg9[%1] : memref<2x!tpu.dma_semaphore, #tpu.memory_space<semaphore_mem>> -> memref<1x!tpu.dma_semaphore, #tpu.memory_space<semaphore_mem>>
      %270 = tpu.memref_squeeze %269 : memref<1x!tpu.dma_semaphore, #tpu.memory_space<semaphore_mem>> -> memref<!tpu.dma_semaphore, #tpu.memory_space<semaphore_mem>>
      tpu.enqueue_dma source(%265 : memref<1x128xf32, #tpu.memory_space<any>>) target(%268 : memref<1x128xf32, #tpu.memory_space<vmem>>) target_semaphore(%270 : memref<!tpu.dma_semaphore, #tpu.memory_space<semaphore_mem>>)
      %c11_i32_189 = arith.constant 11 : i32
      %271 = arith.addi %138, %c11_i32_189 : i32
      %272 = arith.index_cast %arg0 : i32 to index
      %273 = arith.index_cast %271 : i32 to index
      %274 = memref.load %arg2[%272, %273] : memref<2x16xi32, #tpu.memory_space<smem>>
      %c0_i32_190 = arith.constant 0 : i32
      %275 = arith.maxsi %274, %c0_i32_190 : i32
      %c31_i32_191 = arith.constant 31 : i32
      %276 = arith.minsi %275, %c31_i32_191 : i32
      %c0_i32_192 = arith.constant 0 : i32
      %277 = tpu.memref_slice %arg3[%276, %c0_i32_192] : memref<32x128xf32, #tpu.memory_space<any>> -> memref<1x128xf32, #tpu.memory_space<any>>
      %c0_i32_193 = arith.constant 0 : i32
      %c0_i32_194 = arith.constant 0 : i32
      %278 = tpu.memref_slice %arg8[%1, %c0_i32_193, %c0_i32_194] : memref<2x16x128xf32, #tpu.memory_space<vmem>> -> memref<1x16x128xf32, #tpu.memory_space<vmem>>
      %279 = tpu.memref_squeeze %278 : memref<1x16x128xf32, #tpu.memory_space<vmem>> -> memref<16x128xf32, #tpu.memory_space<vmem>>
      %c11_i32_195 = arith.constant 11 : i32
      %c0_i32_196 = arith.constant 0 : i32
      %280 = tpu.memref_slice %279[%c11_i32_195, %c0_i32_196] : memref<16x128xf32, #tpu.memory_space<vmem>> -> memref<1x128xf32, #tpu.memory_space<vmem>>
      %281 = tpu.memref_slice %arg9[%1] : memref<2x!tpu.dma_semaphore, #tpu.memory_space<semaphore_mem>> -> memref<1x!tpu.dma_semaphore, #tpu.memory_space<semaphore_mem>>
      %282 = tpu.memref_squeeze %281 : memref<1x!tpu.dma_semaphore, #tpu.memory_space<semaphore_mem>> -> memref<!tpu.dma_semaphore, #tpu.memory_space<semaphore_mem>>
      tpu.enqueue_dma source(%277 : memref<1x128xf32, #tpu.memory_space<any>>) target(%280 : memref<1x128xf32, #tpu.memory_space<vmem>>) target_semaphore(%282 : memref<!tpu.dma_semaphore, #tpu.memory_space<semaphore_mem>>)
      %c12_i32_197 = arith.constant 12 : i32
      %283 = arith.addi %138, %c12_i32_197 : i32
      %284 = arith.index_cast %arg0 : i32 to index
      %285 = arith.index_cast %283 : i32 to index
      %286 = memref.load %arg2[%284, %285] : memref<2x16xi32, #tpu.memory_space<smem>>
      %c0_i32_198 = arith.constant 0 : i32
      %287 = arith.maxsi %286, %c0_i32_198 : i32
      %c31_i32_199 = arith.constant 31 : i32
      %288 = arith.minsi %287, %c31_i32_199 : i32
      %c0_i32_200 = arith.constant 0 : i32
      %289 = tpu.memref_slice %arg3[%288, %c0_i32_200] : memref<32x128xf32, #tpu.memory_space<any>> -> memref<1x128xf32, #tpu.memory_space<any>>
      %c0_i32_201 = arith.constant 0 : i32
      %c0_i32_202 = arith.constant 0 : i32
      %290 = tpu.memref_slice %arg8[%1, %c0_i32_201, %c0_i32_202] : memref<2x16x128xf32, #tpu.memory_space<vmem>> -> memref<1x16x128xf32, #tpu.memory_space<vmem>>
      %291 = tpu.memref_squeeze %290 : memref<1x16x128xf32, #tpu.memory_space<vmem>> -> memref<16x128xf32, #tpu.memory_space<vmem>>
      %c12_i32_203 = arith.constant 12 : i32
      %c0_i32_204 = arith.constant 0 : i32
      %292 = tpu.memref_slice %291[%c12_i32_203, %c0_i32_204] : memref<16x128xf32, #tpu.memory_space<vmem>> -> memref<1x128xf32, #tpu.memory_space<vmem>>
      %293 = tpu.memref_slice %arg9[%1] : memref<2x!tpu.dma_semaphore, #tpu.memory_space<semaphore_mem>> -> memref<1x!tpu.dma_semaphore, #tpu.memory_space<semaphore_mem>>
      %294 = tpu.memref_squeeze %293 : memref<1x!tpu.dma_semaphore, #tpu.memory_space<semaphore_mem>> -> memref<!tpu.dma_semaphore, #tpu.memory_space<semaphore_mem>>
      tpu.enqueue_dma source(%289 : memref<1x128xf32, #tpu.memory_space<any>>) target(%292 : memref<1x128xf32, #tpu.memory_space<vmem>>) target_semaphore(%294 : memref<!tpu.dma_semaphore, #tpu.memory_space<semaphore_mem>>)
      %c13_i32_205 = arith.constant 13 : i32
      %295 = arith.addi %138, %c13_i32_205 : i32
      %296 = arith.index_cast %arg0 : i32 to index
      %297 = arith.index_cast %295 : i32 to index
      %298 = memref.load %arg2[%296, %297] : memref<2x16xi32, #tpu.memory_space<smem>>
      %c0_i32_206 = arith.constant 0 : i32
      %299 = arith.maxsi %298, %c0_i32_206 : i32
      %c31_i32_207 = arith.constant 31 : i32
      %300 = arith.minsi %299, %c31_i32_207 : i32
      %c0_i32_208 = arith.constant 0 : i32
      %301 = tpu.memref_slice %arg3[%300, %c0_i32_208] : memref<32x128xf32, #tpu.memory_space<any>> -> memref<1x128xf32, #tpu.memory_space<any>>
      %c0_i32_209 = arith.constant 0 : i32
      %c0_i32_210 = arith.constant 0 : i32
      %302 = tpu.memref_slice %arg8[%1, %c0_i32_209, %c0_i32_210] : memref<2x16x128xf32, #tpu.memory_space<vmem>> -> memref<1x16x128xf32, #tpu.memory_space<vmem>>
      %303 = tpu.memref_squeeze %302 : memref<1x16x128xf32, #tpu.memory_space<vmem>> -> memref<16x128xf32, #tpu.memory_space<vmem>>
      %c13_i32_211 = arith.constant 13 : i32
      %c0_i32_212 = arith.constant 0 : i32
      %304 = tpu.memref_slice %303[%c13_i32_211, %c0_i32_212] : memref<16x128xf32, #tpu.memory_space<vmem>> -> memref<1x128xf32, #tpu.memory_space<vmem>>
      %305 = tpu.memref_slice %arg9[%1] : memref<2x!tpu.dma_semaphore, #tpu.memory_space<semaphore_mem>> -> memref<1x!tpu.dma_semaphore, #tpu.memory_space<semaphore_mem>>
      %306 = tpu.memref_squeeze %305 : memref<1x!tpu.dma_semaphore, #tpu.memory_space<semaphore_mem>> -> memref<!tpu.dma_semaphore, #tpu.memory_space<semaphore_mem>>
      tpu.enqueue_dma source(%301 : memref<1x128xf32, #tpu.memory_space<any>>) target(%304 : memref<1x128xf32, #tpu.memory_space<vmem>>) target_semaphore(%306 : memref<!tpu.dma_semaphore, #tpu.memory_space<semaphore_mem>>)
      %c14_i32_213 = arith.constant 14 : i32
      %307 = arith.addi %138, %c14_i32_213 : i32
      %308 = arith.index_cast %arg0 : i32 to index
      %309 = arith.index_cast %307 : i32 to index
      %310 = memref.load %arg2[%308, %309] : memref<2x16xi32, #tpu.memory_space<smem>>
      %c0_i32_214 = arith.constant 0 : i32
      %311 = arith.maxsi %310, %c0_i32_214 : i32
      %c31_i32_215 = arith.constant 31 : i32
      %312 = arith.minsi %311, %c31_i32_215 : i32
      %c0_i32_216 = arith.constant 0 : i32
      %313 = tpu.memref_slice %arg3[%312, %c0_i32_216] : memref<32x128xf32, #tpu.memory_space<any>> -> memref<1x128xf32, #tpu.memory_space<any>>
      %c0_i32_217 = arith.constant 0 : i32
      %c0_i32_218 = arith.constant 0 : i32
      %314 = tpu.memref_slice %arg8[%1, %c0_i32_217, %c0_i32_218] : memref<2x16x128xf32, #tpu.memory_space<vmem>> -> memref<1x16x128xf32, #tpu.memory_space<vmem>>
      %315 = tpu.memref_squeeze %314 : memref<1x16x128xf32, #tpu.memory_space<vmem>> -> memref<16x128xf32, #tpu.memory_space<vmem>>
      %c14_i32_219 = arith.constant 14 : i32
      %c0_i32_220 = arith.constant 0 : i32
      %316 = tpu.memref_slice %315[%c14_i32_219, %c0_i32_220] : memref<16x128xf32, #tpu.memory_space<vmem>> -> memref<1x128xf32, #tpu.memory_space<vmem>>
      %317 = tpu.memref_slice %arg9[%1] : memref<2x!tpu.dma_semaphore, #tpu.memory_space<semaphore_mem>> -> memref<1x!tpu.dma_semaphore, #tpu.memory_space<semaphore_mem>>
      %318 = tpu.memref_squeeze %317 : memref<1x!tpu.dma_semaphore, #tpu.memory_space<semaphore_mem>> -> memref<!tpu.dma_semaphore, #tpu.memory_space<semaphore_mem>>
      tpu.enqueue_dma source(%313 : memref<1x128xf32, #tpu.memory_space<any>>) target(%316 : memref<1x128xf32, #tpu.memory_space<vmem>>) target_semaphore(%318 : memref<!tpu.dma_semaphore, #tpu.memory_space<semaphore_mem>>)
      %c15_i32_221 = arith.constant 15 : i32
      %319 = arith.addi %138, %c15_i32_221 : i32
      %320 = arith.index_cast %arg0 : i32 to index
      %321 = arith.index_cast %319 : i32 to index
      %322 = memref.load %arg2[%320, %321] : memref<2x16xi32, #tpu.memory_space<smem>>
      %c0_i32_222 = arith.constant 0 : i32
      %323 = arith.maxsi %322, %c0_i32_222 : i32
      %c31_i32_223 = arith.constant 31 : i32
      %324 = arith.minsi %323, %c31_i32_223 : i32
      %c0_i32_224 = arith.constant 0 : i32
      %325 = tpu.memref_slice %arg3[%324, %c0_i32_224] : memref<32x128xf32, #tpu.memory_space<any>> -> memref<1x128xf32, #tpu.memory_space<any>>
      %c0_i32_225 = arith.constant 0 : i32
      %c0_i32_226 = arith.constant 0 : i32
      %326 = tpu.memref_slice %arg8[%1, %c0_i32_225, %c0_i32_226] : memref<2x16x128xf32, #tpu.memory_space<vmem>> -> memref<1x16x128xf32, #tpu.memory_space<vmem>>
      %327 = tpu.memref_squeeze %326 : memref<1x16x128xf32, #tpu.memory_space<vmem>> -> memref<16x128xf32, #tpu.memory_space<vmem>>
      %c15_i32_227 = arith.constant 15 : i32
      %c0_i32_228 = arith.constant 0 : i32
      %328 = tpu.memref_slice %327[%c15_i32_227, %c0_i32_228] : memref<16x128xf32, #tpu.memory_space<vmem>> -> memref<1x128xf32, #tpu.memory_space<vmem>>
      %329 = tpu.memref_slice %arg9[%1] : memref<2x!tpu.dma_semaphore, #tpu.memory_space<semaphore_mem>> -> memref<1x!tpu.dma_semaphore, #tpu.memory_space<semaphore_mem>>
      %330 = tpu.memref_squeeze %329 : memref<1x!tpu.dma_semaphore, #tpu.memory_space<semaphore_mem>> -> memref<!tpu.dma_semaphore, #tpu.memory_space<semaphore_mem>>
      tpu.enqueue_dma source(%325 : memref<1x128xf32, #tpu.memory_space<any>>) target(%328 : memref<1x128xf32, #tpu.memory_space<vmem>>) target_semaphore(%330 : memref<!tpu.dma_semaphore, #tpu.memory_space<semaphore_mem>>)
    } else {
    }
    %c0_i32_5 = arith.constant 0 : i32
    %c0_i32_6 = arith.constant 0 : i32
    %9 = tpu.memref_slice %arg3[%c0_i32_5, %c0_i32_6] : memref<32x128xf32, #tpu.memory_space<any>> -> memref<1x128xf32, #tpu.memory_space<any>>
    %c0_i32_7 = arith.constant 0 : i32
    %c0_i32_8 = arith.constant 0 : i32
    %10 = tpu.memref_slice %arg8[%0, %c0_i32_7, %c0_i32_8] : memref<2x16x128xf32, #tpu.memory_space<vmem>> -> memref<1x16x128xf32, #tpu.memory_space<vmem>>
    %11 = tpu.memref_squeeze %10 : memref<1x16x128xf32, #tpu.memory_space<vmem>> -> memref<16x128xf32, #tpu.memory_space<vmem>>
    %c0_i32_9 = arith.constant 0 : i32
    %c0_i32_10 = arith.constant 0 : i32
    %12 = tpu.memref_slice %11[%c0_i32_9, %c0_i32_10] : memref<16x128xf32, #tpu.memory_space<vmem>> -> memref<1x128xf32, #tpu.memory_space<vmem>>
    %13 = tpu.memref_slice %arg9[%0] : memref<2x!tpu.dma_semaphore, #tpu.memory_space<semaphore_mem>> -> memref<1x!tpu.dma_semaphore, #tpu.memory_space<semaphore_mem>>
    %14 = tpu.memref_squeeze %13 : memref<1x!tpu.dma_semaphore, #tpu.memory_space<semaphore_mem>> -> memref<!tpu.dma_semaphore, #tpu.memory_space<semaphore_mem>>
    tpu.wait_dma2 semaphore(%14 : memref<!tpu.dma_semaphore, #tpu.memory_space<semaphore_mem>>) src(%9 : memref<1x128xf32, #tpu.memory_space<any>>) dst(%12 : memref<1x128xf32, #tpu.memory_space<vmem>>)
    %c0_i32_11 = arith.constant 0 : i32
    %c0_i32_12 = arith.constant 0 : i32
    %15 = tpu.memref_slice %arg3[%c0_i32_11, %c0_i32_12] : memref<32x128xf32, #tpu.memory_space<any>> -> memref<1x128xf32, #tpu.memory_space<any>>
    %c0_i32_13 = arith.constant 0 : i32
    %c0_i32_14 = arith.constant 0 : i32
    %16 = tpu.memref_slice %arg8[%0, %c0_i32_13, %c0_i32_14] : memref<2x16x128xf32, #tpu.memory_space<vmem>> -> memref<1x16x128xf32, #tpu.memory_space<vmem>>
    %17 = tpu.memref_squeeze %16 : memref<1x16x128xf32, #tpu.memory_space<vmem>> -> memref<16x128xf32, #tpu.memory_space<vmem>>
    %c1_i32_15 = arith.constant 1 : i32
    %c0_i32_16 = arith.constant 0 : i32
    %18 = tpu.memref_slice %17[%c1_i32_15, %c0_i32_16] : memref<16x128xf32, #tpu.memory_space<vmem>> -> memref<1x128xf32, #tpu.memory_space<vmem>>
    %19 = tpu.memref_slice %arg9[%0] : memref<2x!tpu.dma_semaphore, #tpu.memory_space<semaphore_mem>> -> memref<1x!tpu.dma_semaphore, #tpu.memory_space<semaphore_mem>>
    %20 = tpu.memref_squeeze %19 : memref<1x!tpu.dma_semaphore, #tpu.memory_space<semaphore_mem>> -> memref<!tpu.dma_semaphore, #tpu.memory_space<semaphore_mem>>
    tpu.wait_dma2 semaphore(%20 : memref<!tpu.dma_semaphore, #tpu.memory_space<semaphore_mem>>) src(%15 : memref<1x128xf32, #tpu.memory_space<any>>) dst(%18 : memref<1x128xf32, #tpu.memory_space<vmem>>)
    %c0_i32_17 = arith.constant 0 : i32
    %c0_i32_18 = arith.constant 0 : i32
    %21 = tpu.memref_slice %arg3[%c0_i32_17, %c0_i32_18] : memref<32x128xf32, #tpu.memory_space<any>> -> memref<1x128xf32, #tpu.memory_space<any>>
    %c0_i32_19 = arith.constant 0 : i32
    %c0_i32_20 = arith.constant 0 : i32
    %22 = tpu.memref_slice %arg8[%0, %c0_i32_19, %c0_i32_20] : memref<2x16x128xf32, #tpu.memory_space<vmem>> -> memref<1x16x128xf32, #tpu.memory_space<vmem>>
    %23 = tpu.memref_squeeze %22 : memref<1x16x128xf32, #tpu.memory_space<vmem>> -> memref<16x128xf32, #tpu.memory_space<vmem>>
    %c2_i32 = arith.constant 2 : i32
    %c0_i32_21 = arith.constant 0 : i32
    %24 = tpu.memref_slice %23[%c2_i32, %c0_i32_21] : memref<16x128xf32, #tpu.memory_space<vmem>> -> memref<1x128xf32, #tpu.memory_space<vmem>>
    %25 = tpu.memref_slice %arg9[%0] : memref<2x!tpu.dma_semaphore, #tpu.memory_space<semaphore_mem>> -> memref<1x!tpu.dma_semaphore, #tpu.memory_space<semaphore_mem>>
    %26 = tpu.memref_squeeze %25 : memref<1x!tpu.dma_semaphore, #tpu.memory_space<semaphore_mem>> -> memref<!tpu.dma_semaphore, #tpu.memory_space<semaphore_mem>>
    tpu.wait_dma2 semaphore(%26 : memref<!tpu.dma_semaphore, #tpu.memory_space<semaphore_mem>>) src(%21 : memref<1x128xf32, #tpu.memory_space<any>>) dst(%24 : memref<1x128xf32, #tpu.memory_space<vmem>>)
    %c0_i32_22 = arith.constant 0 : i32
    %c0_i32_23 = arith.constant 0 : i32
    %27 = tpu.memref_slice %arg3[%c0_i32_22, %c0_i32_23] : memref<32x128xf32, #tpu.memory_space<any>> -> memref<1x128xf32, #tpu.memory_space<any>>
    %c0_i32_24 = arith.constant 0 : i32
    %c0_i32_25 = arith.constant 0 : i32
    %28 = tpu.memref_slice %arg8[%0, %c0_i32_24, %c0_i32_25] : memref<2x16x128xf32, #tpu.memory_space<vmem>> -> memref<1x16x128xf32, #tpu.memory_space<vmem>>
    %29 = tpu.memref_squeeze %28 : memref<1x16x128xf32, #tpu.memory_space<vmem>> -> memref<16x128xf32, #tpu.memory_space<vmem>>
    %c3_i32 = arith.constant 3 : i32
    %c0_i32_26 = arith.constant 0 : i32
    %30 = tpu.memref_slice %29[%c3_i32, %c0_i32_26] : memref<16x128xf32, #tpu.memory_space<vmem>> -> memref<1x128xf32, #tpu.memory_space<vmem>>
    %31 = tpu.memref_slice %arg9[%0] : memref<2x!tpu.dma_semaphore, #tpu.memory_space<semaphore_mem>> -> memref<1x!tpu.dma_semaphore, #tpu.memory_space<semaphore_mem>>
    %32 = tpu.memref_squeeze %31 : memref<1x!tpu.dma_semaphore, #tpu.memory_space<semaphore_mem>> -> memref<!tpu.dma_semaphore, #tpu.memory_space<semaphore_mem>>
    tpu.wait_dma2 semaphore(%32 : memref<!tpu.dma_semaphore, #tpu.memory_space<semaphore_mem>>) src(%27 : memref<1x128xf32, #tpu.memory_space<any>>) dst(%30 : memref<1x128xf32, #tpu.memory_space<vmem>>)
    %c0_i32_27 = arith.constant 0 : i32
    %c0_i32_28 = arith.constant 0 : i32
    %33 = tpu.memref_slice %arg3[%c0_i32_27, %c0_i32_28] : memref<32x128xf32, #tpu.memory_space<any>> -> memref<1x128xf32, #tpu.memory_space<any>>
    %c0_i32_29 = arith.constant 0 : i32
    %c0_i32_30 = arith.constant 0 : i32
    %34 = tpu.memref_slice %arg8[%0, %c0_i32_29, %c0_i32_30] : memref<2x16x128xf32, #tpu.memory_space<vmem>> -> memref<1x16x128xf32, #tpu.memory_space<vmem>>
    %35 = tpu.memref_squeeze %34 : memref<1x16x128xf32, #tpu.memory_space<vmem>> -> memref<16x128xf32, #tpu.memory_space<vmem>>
    %c4_i32 = arith.constant 4 : i32
    %c0_i32_31 = arith.constant 0 : i32
    %36 = tpu.memref_slice %35[%c4_i32, %c0_i32_31] : memref<16x128xf32, #tpu.memory_space<vmem>> -> memref<1x128xf32, #tpu.memory_space<vmem>>
    %37 = tpu.memref_slice %arg9[%0] : memref<2x!tpu.dma_semaphore, #tpu.memory_space<semaphore_mem>> -> memref<1x!tpu.dma_semaphore, #tpu.memory_space<semaphore_mem>>
    %38 = tpu.memref_squeeze %37 : memref<1x!tpu.dma_semaphore, #tpu.memory_space<semaphore_mem>> -> memref<!tpu.dma_semaphore, #tpu.memory_space<semaphore_mem>>
    tpu.wait_dma2 semaphore(%38 : memref<!tpu.dma_semaphore, #tpu.memory_space<semaphore_mem>>) src(%33 : memref<1x128xf32, #tpu.memory_space<any>>) dst(%36 : memref<1x128xf32, #tpu.memory_space<vmem>>)
    %c0_i32_32 = arith.constant 0 : i32
    %c0_i32_33 = arith.constant 0 : i32
    %39 = tpu.memref_slice %arg3[%c0_i32_32, %c0_i32_33] : memref<32x128xf32, #tpu.memory_space<any>> -> memref<1x128xf32, #tpu.memory_space<any>>
    %c0_i32_34 = arith.constant 0 : i32
    %c0_i32_35 = arith.constant 0 : i32
    %40 = tpu.memref_slice %arg8[%0, %c0_i32_34, %c0_i32_35] : memref<2x16x128xf32, #tpu.memory_space<vmem>> -> memref<1x16x128xf32, #tpu.memory_space<vmem>>
    %41 = tpu.memref_squeeze %40 : memref<1x16x128xf32, #tpu.memory_space<vmem>> -> memref<16x128xf32, #tpu.memory_space<vmem>>
    %c5_i32 = arith.constant 5 : i32
    %c0_i32_36 = arith.constant 0 : i32
    %42 = tpu.memref_slice %41[%c5_i32, %c0_i32_36] : memref<16x128xf32, #tpu.memory_space<vmem>> -> memref<1x128xf32, #tpu.memory_space<vmem>>
    %43 = tpu.memref_slice %arg9[%0] : memref<2x!tpu.dma_semaphore, #tpu.memory_space<semaphore_mem>> -> memref<1x!tpu.dma_semaphore, #tpu.memory_space<semaphore_mem>>
    %44 = tpu.memref_squeeze %43 : memref<1x!tpu.dma_semaphore, #tpu.memory_space<semaphore_mem>> -> memref<!tpu.dma_semaphore, #tpu.memory_space<semaphore_mem>>
    tpu.wait_dma2 semaphore(%44 : memref<!tpu.dma_semaphore, #tpu.memory_space<semaphore_mem>>) src(%39 : memref<1x128xf32, #tpu.memory_space<any>>) dst(%42 : memref<1x128xf32, #tpu.memory_space<vmem>>)
    %c0_i32_37 = arith.constant 0 : i32
    %c0_i32_38 = arith.constant 0 : i32
    %45 = tpu.memref_slice %arg3[%c0_i32_37, %c0_i32_38] : memref<32x128xf32, #tpu.memory_space<any>> -> memref<1x128xf32, #tpu.memory_space<any>>
    %c0_i32_39 = arith.constant 0 : i32
    %c0_i32_40 = arith.constant 0 : i32
    %46 = tpu.memref_slice %arg8[%0, %c0_i32_39, %c0_i32_40] : memref<2x16x128xf32, #tpu.memory_space<vmem>> -> memref<1x16x128xf32, #tpu.memory_space<vmem>>
    %47 = tpu.memref_squeeze %46 : memref<1x16x128xf32, #tpu.memory_space<vmem>> -> memref<16x128xf32, #tpu.memory_space<vmem>>
    %c6_i32 = arith.constant 6 : i32
    %c0_i32_41 = arith.constant 0 : i32
    %48 = tpu.memref_slice %47[%c6_i32, %c0_i32_41] : memref<16x128xf32, #tpu.memory_space<vmem>> -> memref<1x128xf32, #tpu.memory_space<vmem>>
    %49 = tpu.memref_slice %arg9[%0] : memref<2x!tpu.dma_semaphore, #tpu.memory_space<semaphore_mem>> -> memref<1x!tpu.dma_semaphore, #tpu.memory_space<semaphore_mem>>
    %50 = tpu.memref_squeeze %49 : memref<1x!tpu.dma_semaphore, #tpu.memory_space<semaphore_mem>> -> memref<!tpu.dma_semaphore, #tpu.memory_space<semaphore_mem>>
    tpu.wait_dma2 semaphore(%50 : memref<!tpu.dma_semaphore, #tpu.memory_space<semaphore_mem>>) src(%45 : memref<1x128xf32, #tpu.memory_space<any>>) dst(%48 : memref<1x128xf32, #tpu.memory_space<vmem>>)
    %c0_i32_42 = arith.constant 0 : i32
    %c0_i32_43 = arith.constant 0 : i32
    %51 = tpu.memref_slice %arg3[%c0_i32_42, %c0_i32_43] : memref<32x128xf32, #tpu.memory_space<any>> -> memref<1x128xf32, #tpu.memory_space<any>>
    %c0_i32_44 = arith.constant 0 : i32
    %c0_i32_45 = arith.constant 0 : i32
    %52 = tpu.memref_slice %arg8[%0, %c0_i32_44, %c0_i32_45] : memref<2x16x128xf32, #tpu.memory_space<vmem>> -> memref<1x16x128xf32, #tpu.memory_space<vmem>>
    %53 = tpu.memref_squeeze %52 : memref<1x16x128xf32, #tpu.memory_space<vmem>> -> memref<16x128xf32, #tpu.memory_space<vmem>>
    %c7_i32 = arith.constant 7 : i32
    %c0_i32_46 = arith.constant 0 : i32
    %54 = tpu.memref_slice %53[%c7_i32, %c0_i32_46] : memref<16x128xf32, #tpu.memory_space<vmem>> -> memref<1x128xf32, #tpu.memory_space<vmem>>
    %55 = tpu.memref_slice %arg9[%0] : memref<2x!tpu.dma_semaphore, #tpu.memory_space<semaphore_mem>> -> memref<1x!tpu.dma_semaphore, #tpu.memory_space<semaphore_mem>>
    %56 = tpu.memref_squeeze %55 : memref<1x!tpu.dma_semaphore, #tpu.memory_space<semaphore_mem>> -> memref<!tpu.dma_semaphore, #tpu.memory_space<semaphore_mem>>
    tpu.wait_dma2 semaphore(%56 : memref<!tpu.dma_semaphore, #tpu.memory_space<semaphore_mem>>) src(%51 : memref<1x128xf32, #tpu.memory_space<any>>) dst(%54 : memref<1x128xf32, #tpu.memory_space<vmem>>)
    %c0_i32_47 = arith.constant 0 : i32
    %c0_i32_48 = arith.constant 0 : i32
    %57 = tpu.memref_slice %arg3[%c0_i32_47, %c0_i32_48] : memref<32x128xf32, #tpu.memory_space<any>> -> memref<1x128xf32, #tpu.memory_space<any>>
    %c0_i32_49 = arith.constant 0 : i32
    %c0_i32_50 = arith.constant 0 : i32
    %58 = tpu.memref_slice %arg8[%0, %c0_i32_49, %c0_i32_50] : memref<2x16x128xf32, #tpu.memory_space<vmem>> -> memref<1x16x128xf32, #tpu.memory_space<vmem>>
    %59 = tpu.memref_squeeze %58 : memref<1x16x128xf32, #tpu.memory_space<vmem>> -> memref<16x128xf32, #tpu.memory_space<vmem>>
    %c8_i32 = arith.constant 8 : i32
    %c0_i32_51 = arith.constant 0 : i32
    %60 = tpu.memref_slice %59[%c8_i32, %c0_i32_51] : memref<16x128xf32, #tpu.memory_space<vmem>> -> memref<1x128xf32, #tpu.memory_space<vmem>>
    %61 = tpu.memref_slice %arg9[%0] : memref<2x!tpu.dma_semaphore, #tpu.memory_space<semaphore_mem>> -> memref<1x!tpu.dma_semaphore, #tpu.memory_space<semaphore_mem>>
    %62 = tpu.memref_squeeze %61 : memref<1x!tpu.dma_semaphore, #tpu.memory_space<semaphore_mem>> -> memref<!tpu.dma_semaphore, #tpu.memory_space<semaphore_mem>>
    tpu.wait_dma2 semaphore(%62 : memref<!tpu.dma_semaphore, #tpu.memory_space<semaphore_mem>>) src(%57 : memref<1x128xf32, #tpu.memory_space<any>>) dst(%60 : memref<1x128xf32, #tpu.memory_space<vmem>>)
    %c0_i32_52 = arith.constant 0 : i32
    %c0_i32_53 = arith.constant 0 : i32
    %63 = tpu.memref_slice %arg3[%c0_i32_52, %c0_i32_53] : memref<32x128xf32, #tpu.memory_space<any>> -> memref<1x128xf32, #tpu.memory_space<any>>
    %c0_i32_54 = arith.constant 0 : i32
    %c0_i32_55 = arith.constant 0 : i32
    %64 = tpu.memref_slice %arg8[%0, %c0_i32_54, %c0_i32_55] : memref<2x16x128xf32, #tpu.memory_space<vmem>> -> memref<1x16x128xf32, #tpu.memory_space<vmem>>
    %65 = tpu.memref_squeeze %64 : memref<1x16x128xf32, #tpu.memory_space<vmem>> -> memref<16x128xf32, #tpu.memory_space<vmem>>
    %c9_i32 = arith.constant 9 : i32
    %c0_i32_56 = arith.constant 0 : i32
    %66 = tpu.memref_slice %65[%c9_i32, %c0_i32_56] : memref<16x128xf32, #tpu.memory_space<vmem>> -> memref<1x128xf32, #tpu.memory_space<vmem>>
    %67 = tpu.memref_slice %arg9[%0] : memref<2x!tpu.dma_semaphore, #tpu.memory_space<semaphore_mem>> -> memref<1x!tpu.dma_semaphore, #tpu.memory_space<semaphore_mem>>
    %68 = tpu.memref_squeeze %67 : memref<1x!tpu.dma_semaphore, #tpu.memory_space<semaphore_mem>> -> memref<!tpu.dma_semaphore, #tpu.memory_space<semaphore_mem>>
    tpu.wait_dma2 semaphore(%68 : memref<!tpu.dma_semaphore, #tpu.memory_space<semaphore_mem>>) src(%63 : memref<1x128xf32, #tpu.memory_space<any>>) dst(%66 : memref<1x128xf32, #tpu.memory_space<vmem>>)
    %c0_i32_57 = arith.constant 0 : i32
    %c0_i32_58 = arith.constant 0 : i32
    %69 = tpu.memref_slice %arg3[%c0_i32_57, %c0_i32_58] : memref<32x128xf32, #tpu.memory_space<any>> -> memref<1x128xf32, #tpu.memory_space<any>>
    %c0_i32_59 = arith.constant 0 : i32
    %c0_i32_60 = arith.constant 0 : i32
    %70 = tpu.memref_slice %arg8[%0, %c0_i32_59, %c0_i32_60] : memref<2x16x128xf32, #tpu.memory_space<vmem>> -> memref<1x16x128xf32, #tpu.memory_space<vmem>>
    %71 = tpu.memref_squeeze %70 : memref<1x16x128xf32, #tpu.memory_space<vmem>> -> memref<16x128xf32, #tpu.memory_space<vmem>>
    %c10_i32 = arith.constant 10 : i32
    %c0_i32_61 = arith.constant 0 : i32
    %72 = tpu.memref_slice %71[%c10_i32, %c0_i32_61] : memref<16x128xf32, #tpu.memory_space<vmem>> -> memref<1x128xf32, #tpu.memory_space<vmem>>
    %73 = tpu.memref_slice %arg9[%0] : memref<2x!tpu.dma_semaphore, #tpu.memory_space<semaphore_mem>> -> memref<1x!tpu.dma_semaphore, #tpu.memory_space<semaphore_mem>>
    %74 = tpu.memref_squeeze %73 : memref<1x!tpu.dma_semaphore, #tpu.memory_space<semaphore_mem>> -> memref<!tpu.dma_semaphore, #tpu.memory_space<semaphore_mem>>
    tpu.wait_dma2 semaphore(%74 : memref<!tpu.dma_semaphore, #tpu.memory_space<semaphore_mem>>) src(%69 : memref<1x128xf32, #tpu.memory_space<any>>) dst(%72 : memref<1x128xf32, #tpu.memory_space<vmem>>)
    %c0_i32_62 = arith.constant 0 : i32
    %c0_i32_63 = arith.constant 0 : i32
    %75 = tpu.memref_slice %arg3[%c0_i32_62, %c0_i32_63] : memref<32x128xf32, #tpu.memory_space<any>> -> memref<1x128xf32, #tpu.memory_space<any>>
    %c0_i32_64 = arith.constant 0 : i32
    %c0_i32_65 = arith.constant 0 : i32
    %76 = tpu.memref_slice %arg8[%0, %c0_i32_64, %c0_i32_65] : memref<2x16x128xf32, #tpu.memory_space<vmem>> -> memref<1x16x128xf32, #tpu.memory_space<vmem>>
    %77 = tpu.memref_squeeze %76 : memref<1x16x128xf32, #tpu.memory_space<vmem>> -> memref<16x128xf32, #tpu.memory_space<vmem>>
    %c11_i32 = arith.constant 11 : i32
    %c0_i32_66 = arith.constant 0 : i32
    %78 = tpu.memref_slice %77[%c11_i32, %c0_i32_66] : memref<16x128xf32, #tpu.memory_space<vmem>> -> memref<1x128xf32, #tpu.memory_space<vmem>>
    %79 = tpu.memref_slice %arg9[%0] : memref<2x!tpu.dma_semaphore, #tpu.memory_space<semaphore_mem>> -> memref<1x!tpu.dma_semaphore, #tpu.memory_space<semaphore_mem>>
    %80 = tpu.memref_squeeze %79 : memref<1x!tpu.dma_semaphore, #tpu.memory_space<semaphore_mem>> -> memref<!tpu.dma_semaphore, #tpu.memory_space<semaphore_mem>>
    tpu.wait_dma2 semaphore(%80 : memref<!tpu.dma_semaphore, #tpu.memory_space<semaphore_mem>>) src(%75 : memref<1x128xf32, #tpu.memory_space<any>>) dst(%78 : memref<1x128xf32, #tpu.memory_space<vmem>>)
    %c0_i32_67 = arith.constant 0 : i32
    %c0_i32_68 = arith.constant 0 : i32
    %81 = tpu.memref_slice %arg3[%c0_i32_67, %c0_i32_68] : memref<32x128xf32, #tpu.memory_space<any>> -> memref<1x128xf32, #tpu.memory_space<any>>
    %c0_i32_69 = arith.constant 0 : i32
    %c0_i32_70 = arith.constant 0 : i32
    %82 = tpu.memref_slice %arg8[%0, %c0_i32_69, %c0_i32_70] : memref<2x16x128xf32, #tpu.memory_space<vmem>> -> memref<1x16x128xf32, #tpu.memory_space<vmem>>
    %83 = tpu.memref_squeeze %82 : memref<1x16x128xf32, #tpu.memory_space<vmem>> -> memref<16x128xf32, #tpu.memory_space<vmem>>
    %c12_i32 = arith.constant 12 : i32
    %c0_i32_71 = arith.constant 0 : i32
    %84 = tpu.memref_slice %83[%c12_i32, %c0_i32_71] : memref<16x128xf32, #tpu.memory_space<vmem>> -> memref<1x128xf32, #tpu.memory_space<vmem>>
    %85 = tpu.memref_slice %arg9[%0] : memref<2x!tpu.dma_semaphore, #tpu.memory_space<semaphore_mem>> -> memref<1x!tpu.dma_semaphore, #tpu.memory_space<semaphore_mem>>
    %86 = tpu.memref_squeeze %85 : memref<1x!tpu.dma_semaphore, #tpu.memory_space<semaphore_mem>> -> memref<!tpu.dma_semaphore, #tpu.memory_space<semaphore_mem>>
    tpu.wait_dma2 semaphore(%86 : memref<!tpu.dma_semaphore, #tpu.memory_space<semaphore_mem>>) src(%81 : memref<1x128xf32, #tpu.memory_space<any>>) dst(%84 : memref<1x128xf32, #tpu.memory_space<vmem>>)
    %c0_i32_72 = arith.constant 0 : i32
    %c0_i32_73 = arith.constant 0 : i32
    %87 = tpu.memref_slice %arg3[%c0_i32_72, %c0_i32_73] : memref<32x128xf32, #tpu.memory_space<any>> -> memref<1x128xf32, #tpu.memory_space<any>>
    %c0_i32_74 = arith.constant 0 : i32
    %c0_i32_75 = arith.constant 0 : i32
    %88 = tpu.memref_slice %arg8[%0, %c0_i32_74, %c0_i32_75] : memref<2x16x128xf32, #tpu.memory_space<vmem>> -> memref<1x16x128xf32, #tpu.memory_space<vmem>>
    %89 = tpu.memref_squeeze %88 : memref<1x16x128xf32, #tpu.memory_space<vmem>> -> memref<16x128xf32, #tpu.memory_space<vmem>>
    %c13_i32 = arith.constant 13 : i32
    %c0_i32_76 = arith.constant 0 : i32
    %90 = tpu.memref_slice %89[%c13_i32, %c0_i32_76] : memref<16x128xf32, #tpu.memory_space<vmem>> -> memref<1x128xf32, #tpu.memory_space<vmem>>
    %91 = tpu.memref_slice %arg9[%0] : memref<2x!tpu.dma_semaphore, #tpu.memory_space<semaphore_mem>> -> memref<1x!tpu.dma_semaphore, #tpu.memory_space<semaphore_mem>>
    %92 = tpu.memref_squeeze %91 : memref<1x!tpu.dma_semaphore, #tpu.memory_space<semaphore_mem>> -> memref<!tpu.dma_semaphore, #tpu.memory_space<semaphore_mem>>
    tpu.wait_dma2 semaphore(%92 : memref<!tpu.dma_semaphore, #tpu.memory_space<semaphore_mem>>) src(%87 : memref<1x128xf32, #tpu.memory_space<any>>) dst(%90 : memref<1x128xf32, #tpu.memory_space<vmem>>)
    %c0_i32_77 = arith.constant 0 : i32
    %c0_i32_78 = arith.constant 0 : i32
    %93 = tpu.memref_slice %arg3[%c0_i32_77, %c0_i32_78] : memref<32x128xf32, #tpu.memory_space<any>> -> memref<1x128xf32, #tpu.memory_space<any>>
    %c0_i32_79 = arith.constant 0 : i32
    %c0_i32_80 = arith.constant 0 : i32
    %94 = tpu.memref_slice %arg8[%0, %c0_i32_79, %c0_i32_80] : memref<2x16x128xf32, #tpu.memory_space<vmem>> -> memref<1x16x128xf32, #tpu.memory_space<vmem>>
    %95 = tpu.memref_squeeze %94 : memref<1x16x128xf32, #tpu.memory_space<vmem>> -> memref<16x128xf32, #tpu.memory_space<vmem>>
    %c14_i32 = arith.constant 14 : i32
    %c0_i32_81 = arith.constant 0 : i32
    %96 = tpu.memref_slice %95[%c14_i32, %c0_i32_81] : memref<16x128xf32, #tpu.memory_space<vmem>> -> memref<1x128xf32, #tpu.memory_space<vmem>>
    %97 = tpu.memref_slice %arg9[%0] : memref<2x!tpu.dma_semaphore, #tpu.memory_space<semaphore_mem>> -> memref<1x!tpu.dma_semaphore, #tpu.memory_space<semaphore_mem>>
    %98 = tpu.memref_squeeze %97 : memref<1x!tpu.dma_semaphore, #tpu.memory_space<semaphore_mem>> -> memref<!tpu.dma_semaphore, #tpu.memory_space<semaphore_mem>>
    tpu.wait_dma2 semaphore(%98 : memref<!tpu.dma_semaphore, #tpu.memory_space<semaphore_mem>>) src(%93 : memref<1x128xf32, #tpu.memory_space<any>>) dst(%96 : memref<1x128xf32, #tpu.memory_space<vmem>>)
    %c0_i32_82 = arith.constant 0 : i32
    %c0_i32_83 = arith.constant 0 : i32
    %99 = tpu.memref_slice %arg3[%c0_i32_82, %c0_i32_83] : memref<32x128xf32, #tpu.memory_space<any>> -> memref<1x128xf32, #tpu.memory_space<any>>
    %c0_i32_84 = arith.constant 0 : i32
    %c0_i32_85 = arith.constant 0 : i32
    %100 = tpu.memref_slice %arg8[%0, %c0_i32_84, %c0_i32_85] : memref<2x16x128xf32, #tpu.memory_space<vmem>> -> memref<1x16x128xf32, #tpu.memory_space<vmem>>
    %101 = tpu.memref_squeeze %100 : memref<1x16x128xf32, #tpu.memory_space<vmem>> -> memref<16x128xf32, #tpu.memory_space<vmem>>
    %c15_i32 = arith.constant 15 : i32
    %c0_i32_86 = arith.constant 0 : i32
    %102 = tpu.memref_slice %101[%c15_i32, %c0_i32_86] : memref<16x128xf32, #tpu.memory_space<vmem>> -> memref<1x128xf32, #tpu.memory_space<vmem>>
    %103 = tpu.memref_slice %arg9[%0] : memref<2x!tpu.dma_semaphore, #tpu.memory_space<semaphore_mem>> -> memref<1x!tpu.dma_semaphore, #tpu.memory_space<semaphore_mem>>
    %104 = tpu.memref_squeeze %103 : memref<1x!tpu.dma_semaphore, #tpu.memory_space<semaphore_mem>> -> memref<!tpu.dma_semaphore, #tpu.memory_space<semaphore_mem>>
    tpu.wait_dma2 semaphore(%104 : memref<!tpu.dma_semaphore, #tpu.memory_space<semaphore_mem>>) src(%99 : memref<1x128xf32, #tpu.memory_space<any>>) dst(%102 : memref<1x128xf32, #tpu.memory_space<vmem>>)
    %105 = arith.index_cast %0 : i32 to index
    %c0 = arith.constant 0 : index
    %c0_87 = arith.constant 0 : index
    %106 = vector.load %arg8[%105, %c0, %c0_87] : memref<2x16x128xf32, #tpu.memory_space<vmem>>, vector<1x16x128xf32>
    %107 = vector.shape_cast %106 : vector<1x16x128xf32> to vector<16x128xf32>
    %c0_88 = arith.constant 0 : index
    %c0_89 = arith.constant 0 : index
    %108 = vector.load %arg4[%c0_88, %c0_89] : memref<16x128xf32, #tpu.memory_space<vmem>>, vector<16x128xf32>
    %109 = arith.addf %107, %108 : vector<16x128xf32>
    %cst = arith.constant dense<0.000000e+00> : vector<16xf32>
    %110 = vector.multi_reduction <add>, %109, %cst [1] : vector<16x128xf32> to vector<16xf32>
    %111 = vector.shape_cast %110 : vector<16xf32> to vector<16x1xf32>
    %cst_90 = arith.constant 1.280000e+02 : f32
    %112 = vector.broadcast %cst_90 : f32 to vector<16x1xf32>
    %113 = arith.divf %111, %112 : vector<16x1xf32>
    %114 = vector.broadcast %113 : vector<16x1xf32> to vector<16x128xf32>
    %115 = arith.subf %109, %114 : vector<16x128xf32>
    %116 = arith.mulf %115, %115 : vector<16x128xf32>
    %cst_91 = arith.constant dense<0.000000e+00> : vector<16xf32>
    %117 = vector.multi_reduction <add>, %116, %cst_91 [1] : vector<16x128xf32> to vector<16xf32>
    %118 = vector.shape_cast %117 : vector<16xf32> to vector<16x1xf32>
    %cst_92 = arith.constant 1.280000e+02 : f32
    %119 = vector.broadcast %cst_92 : f32 to vector<16x1xf32>
    %120 = arith.divf %118, %119 : vector<16x1xf32>
    %121 = vector.broadcast %113 : vector<16x1xf32> to vector<16x128xf32>
    %122 = arith.subf %109, %121 : vector<16x128xf32>
    %cst_93 = arith.constant 9.99999974E-6 : f32
    %123 = vector.broadcast %cst_93 : f32 to vector<16x1xf32>
    %124 = arith.addf %120, %123 : vector<16x1xf32>
    %125 = math.rsqrt %124 : vector<16x1xf32>
    %126 = vector.broadcast %125 : vector<16x1xf32> to vector<16x128xf32>
    %127 = arith.mulf %122, %126 : vector<16x128xf32>
    %c0_94 = arith.constant 0 : index
    %c0_95 = arith.constant 0 : index
    %128 = vector.load %arg5[%c0_94, %c0_95] : memref<1x128xf32, #tpu.memory_space<vmem>>, vector<1x128xf32>
    %129 = vector.broadcast %128 : vector<1x128xf32> to vector<16x128xf32>
    %130 = arith.mulf %127, %129 : vector<16x128xf32>
    %c0_96 = arith.constant 0 : index
    %c0_97 = arith.constant 0 : index
    %131 = vector.load %arg6[%c0_96, %c0_97] : memref<1x128xf32, #tpu.memory_space<vmem>>, vector<1x128xf32>
    %132 = vector.broadcast %131 : vector<1x128xf32> to vector<16x128xf32>
    %133 = arith.addf %130, %132 : vector<16x128xf32>
    %c0_98 = arith.constant 0 : index
    %c0_99 = arith.constant 0 : index
    %c0_100 = arith.constant 0 : index
    %134 = vector.load %arg7[%c0_98, %c0_99, %c0_100] : memref<1x16x128xf32, #tpu.memory_space<vmem>>, vector<1x16x128xf32>
    %135 = vector.shape_cast %134 : vector<1x16x128xf32> to vector<16x128xf32>
    %136 = vector.shape_cast %133 : vector<16x128xf32> to vector<1x16x128xf32>
    tpu.vector_store %arg7[%c0_98, %c0_99, %c0_100], %136 {strides = array<i32>} : memref<1x16x128xf32, #tpu.memory_space<vmem>>, vector<1x16x128xf32>,
    return
  }
  func.func @transform_1(%arg0: i32, %arg1: i32, %arg2: memref<2x16xi32, #tpu.memory_space<smem>>) -> (i32, i32) {
    %c0_i32 = arith.constant 0 : i32
    %c0_i32_0 = arith.constant 0 : i32
    return %arg1, %c0_i32 : i32, i32
  }
  func.func @transform_2(%arg0: i32, %arg1: i32, %arg2: memref<2x16xi32, #tpu.memory_space<smem>>) -> (i32, i32) {
    %c0_i32 = arith.constant 0 : i32
    %c0_i32_0 = arith.constant 0 : i32
    %c0_i32_1 = arith.constant 0 : i32
    return %c0_i32, %c0_i32_0 : i32, i32
  }
  func.func @transform_3(%arg0: i32, %arg1: i32, %arg2: memref<2x16xi32, #tpu.memory_space<smem>>) -> (i32, i32) {
    %c0_i32 = arith.constant 0 : i32
    %c0_i32_0 = arith.constant 0 : i32
    %c0_i32_1 = arith.constant 0 : i32
    return %c0_i32, %c0_i32_0 : i32, i32
  }
  func.func @transform_4(%arg0: i32, %arg1: i32, %arg2: memref<2x16xi32, #tpu.memory_space<smem>>) -> (i32, i32, i32) {
    %c0_i32 = arith.constant 0 : i32
    %c0_i32_0 = arith.constant 0 : i32
    return %arg0, %arg1, %c0_i32 : i32, i32, i32
  }
}

</mosaic_0001>

<bundles_post_ra>
// kernel: tpu_custom_call.1
= control target key start
LH: loop header
LB: loop body
LE: loop exit
PB: predicated region body
PF: predicated region fallthrough
CT: control target
= control target key end

     0   :  { %s2717_s0 = inlined_call_operand.hbm [shape: s32[2,16], index: 0, kind: input, shape index: {}]   ;;  %s2718_s1 = inlined_call_operand.hbm [shape: f32[32,128], index: 1, kind: input, shape index: {}]   ;;  %s2719_s2 = inlined_call_operand.hbm [shape: f32[16,128], index: 2, kind: input, shape index: {}]   ;;  %s2720_s3 = inlined_call_operand.vmem [shape: f32[1,128], index: 3, kind: input, shape index: {}]   ;;  %s2721_s4 = inlined_call_operand.vmem [shape: f32[1,128], index: 4, kind: input, shape index: {}]   ;;  %s2722_s5 = inlined_call_operand.hbm [shape: f32[2,16,128], index: 5, kind: output, shape index: {}]  }
   0x1   :  { %2732 = sst [smem:[#allocation85_spill]] %s2719_s2  ;;  %s1613_s20 = scalar_lea.hbm %s2717_s0, 32 }
   0x2   :  { %p1614_p0 = scmp.ne.s32.totalorder %s2717_s0, %s1613_s20  ;;  %p1617_p1 = scmp.lt.u32.totalorder %s1613_s20, %s2717_s0 }
   0x4   :  { %p1619_p2 = pnand %p1617_p1, %p1614_p0 }
   0x6   :  { %1622 = shalt.err (!%p1619_p2)  }
   0x7   :  { %s2123_s25 = smov [#allocation5]  }
   0x8   :  { %11 = dma.hbm_to_smem %s2717_s0, 32, %s2123_s25, [#allocation4] }
   0x9   :  { %2087 = dma.done.wait [#allocation4], 32 }
   0xa   :  { %2088 = vsyncadd [#allocation4], 4294967264 }
   0xb   :  { %13 = sfence }
   0xc   :  { %14 = vsyncpa [#allocation7], 0 }
   0xd   :  { %15 = vsyncpa [#allocation8], 0 }
   0xe   :  { %17 = vsyncpa [#allocation8 + $0x1], 0  ;;  %s2188_s28 = smov 0   ;;  %s2190_s29 = smov 0  }
   0xf   :  { %s2192_s30 = smov 0   ;;  %s2194_s6 = smov 0  }
  0x10   :  { %s2196_s7 = smov 0   ;;  %s2198_s8 = smov 0  }
  0x11 LB: > { %2733 = sst [smem:[#allocation80_spill]] %s2109_s30  ;;  %s1217_s0 = sadd.s32 4294967295, %s2121_s8   ;;  %s2121_s8 = sphi %s2198_s8, %s23_s8   ;;  %s2117_s7 = sphi %s2196_s7, %s2755_s7   ;;  %s2113_s6 = sphi %s2194_s6, %s2754_s6   ;;  %s2109_s30 = sphi %s2192_s30, %s2753_s30   ;;  %s2105_s29 = sphi %s2190_s29, %s2757_s29   ;;  %s2101_s28 = sphi %s2188_s28, %s2756_s28  }
  0x12   : > { %2734 = sst [smem:[#allocation81_spill]] %s2117_s7  ;;  %s1218_s9 = sadd.s32 4294967294, %s2121_s8  }
  0x13   : > { %s35_s10 = sadd.s32 1, %s2117_s7  ;;  %s112_s11 = sadd.s32 1, %s2109_s30 }
  0x14   : > { %p37_p3 = scmp.ge.s32.totalorder %s35_s10, 2  ;;  %p122_p4 = scmp.ne.s32.totalorder %s2109_s30, %s2105_s29 }
  0x15   : > { %p123_p5 = scmp.eq.s32.totalorder %s1217_s0, 1  ;;  %p128_p6 = scmp.ne.s32.totalorder %s2105_s29, %s2101_s28 }
  0x16   : > { %s2759_s10 = smov (%p37_p3, %s35_s10), 0  ;;  %p129_p8 = scmp.eq.s32.totalorder %s1218_s9, 1 }
  0x17   : > { %2735 = sst [smem:[#allocation82_spill]] %s2759_s10  ;;  %p2228_p7 = por %p123_p5, %p122_p4 }
  0x18   : > { %s107_s13 = ssub.s32 %s2117_s7, %s2759_s10  ;;  %p1219_p9 = scmp.ge.s32.totalorder %s2121_s8, 1 }
  0x19   : > { %s2736_s12 = scalar_select %p2228_p7, 1, 0 }
  0x1a   : > { %p110_p10 = scmp.eq.s32.totalorder %s107_s13, 0  ;;  %p2235_p11 = por %p129_p8, %p128_p6 }
  0x1b   : > { %p136_p12 = scmp.lt.s32.totalorder %s2121_s8, 3  ;;  %p2247_p0 = scmp.eq.s32.totalorder %s1217_s0, 0 }
  0x1c   : > { %s2737_s14 = scalar_select %p2235_p11, 1, 0 }
  0x1d   : > { %s2241_s15 = scalar_select %p110_p10, %s2109_s30, %s112_s11  }
  0x1e   : > { %2738 = sst [smem:[#allocation83_spill]] %s2737_s14  ;;  %p2243_p13 = pnand %p1219_p9, %p136_p12 }
  0x1f   : > { %2739 = sst [smem:[#allocation84_spill]] %s2241_s15  ;;  %s2124_s18 = smov [#allocation6]  }
  0x20   : > { %s2740_s16 = scalar_select %p2243_p13, 1, 0 }
  0x21   : > { %s2741_s17 = scalar_select %p2247_p0, 1, 0 }
  0x22   : > { %p1528_p1 = pneg %p2243_p13  ;;  %s151_s19 = sshll.u32 %s2124_s18, 4  ;;  %s152_s19 = int_to_ptr.vmem [resolvable:$true] %s151_s19 }
  0x23   : > { %s2743_s2 = sld [smem:[#allocation85_spill]] }
  0x24   : > { %p2255_p2 = pnand %p2247_p0, %p1528_p1 }
  0x26   : > { %p1625_p4 = pneg %p2255_p2 }
  0x29   : > { %s1623_s23 = scalar_lea.hbm %s2743_s2, 256 }
  0x2a   : > { %p1624_p3 = scmp.ne.s32.totalorder %s2743_s2, %s1623_s23  ;;  %p1630_p8 = scmp.lt.u32.totalorder %s1623_s23, %s2743_s2 }
  0x2c   : > { %p1626_p5 = pnand %p1625_p4, %p1624_p3 }
  0x2e   : > { %p1627_p6 = pneg %p1626_p5 }
  0x30   : > { %p1632_p9 = pnand %p1630_p8, %p1627_p6 }
  0x32   : > { %1635 = shalt.err (!%p1632_p9)
}
  0x33   : > { %s1636_s0 = scalar_lea.vmem %s152_s19, 256  ;;  %p1644_p11 = scmp.lt.s32.totalorder %s152_s19, %s152_s19 }
  0x34   : > { %p1637_p10 = scmp.ne.s32.totalorder %s152_s19, %s1636_s0  ;;  %p1645_p7 = scmp.lt.s32.totalorder %s1636_s0, %s1636_s0 }
  0x36   : > { %p1639_p12 = pnand %p1637_p10, %p1625_p4  ;;  %p1646_p0 = por %p1645_p7, %p1644_p11 }
  0x38   : > { %p1640_p1 = pneg %p1639_p12 }
  0x3a   : > { %p1647_p13 = pnand %p1646_p0, %p1640_p1 }
  0x3c   : > { %1650 = shalt.err (!%p1647_p13)
}
  0x3d   : > { %s2125_s9 = smov 128   ;;  %s2126_s11 = smov 8  }
  0x3e   : > { %1531 = dma.hbm_to_vmem [thread:$0]  (!%p2255_p2), %s2743_s2, 256, %s152_s19, [#allocation7], %s2125_s9, %s2125_s9, %s2126_s11  }
  0x3f   : > { %p2744_p3 = scmp.ne.s32.totalorder %s2740_s16, 0 }
  0x40   : > { %p2745_p5 = scmp.ne.s32.totalorder (!%p2744_p3), %s2741_s17, 0 }
  0x41   : > { %173 = sbr.rel (%p2744_p3) target bundleno = 814 (0x32e), region = 32 }
  0x48   : > { %2090 = dma.done.wait (%p2745_p5), [#allocation7], 256  }
  0x49   : > { %2092 = vsyncadd (%p2745_p5), [#allocation7], 4294967040  ;;  %s2727_s21 = sand.u32 1, %s2105_s29   ;;  %s2283_s22 = sshll.u32 %s2113_s6, 7 }
  0x4a   : > { %s2287_s19 = sshll.u32 %s2727_s21, 4  ;;  %s201_s16 = sld [smem:[#allocation5 + %s2283_s22]] }
  0x4b   : > { %s2127_s20 = smov [#allocation2]   ;;  %s219_s24 = sadd.s32 1, %s2283_s22 }
  0x4c   : > { %s215_s23 = sshll.u32 %s2127_s20, 4  ;;  %s2293_s17 = sld [smem:[#allocation5 + %s219_s24]]  ;;  %s2291_s23 = int_to_ptr.vmem [resolvable:$true] %s215_s23 }
  0x4d   : > { %s239_s25 = sadd.s32 2, %s2283_s22  ;;  %s2128_s26 = smov [#allocation2 + $0x1]  }
  0x4e   : > { %s235_s27 = sshll.u32 %s2128_s26, 4  ;;  %s2296_s0 = sld [smem:[#allocation5 + %s239_s25]]  ;;  %s2298_s27 = int_to_ptr.vmem [resolvable:$true] %s235_s27 }
  0x4f   : > { %s2311_s21 = scalar_lea.hbm %s2718_s1, 512 }
  0x50   : > { %p202_p7 = scmp.gt.s32.totalorder %s201_s16, 0  ;;  %p1225_p11 = scmp.lt.s32.totalorder %s201_s16, 31 }
  0x52   : > { %s2761_s16 = smov (!%p202_p7, %s201_s16), 0  ;;  %p221_p13 = scmp.gt.s32.totalorder %s2293_s17, 0 }
  0x53   : > { %p1231_p0 = scmp.lt.s32.totalorder %s2293_s17, 31  ;;  %s2763_s16 = smov (!%p1225_p11, %s2761_s16), 31 }
  0x54   : > { %s222_s9 = scalar_select %p221_p13, %s2293_s17, 0 }
  0x55   : > { %s1230_s11 = sshll.u32 %s2763_s16, 4  ;;  %p241_p2 = scmp.gt.s32.totalorder %s2296_s0, 0 }
  0x56   : > { %s207_s20 = scalar_lea.hbm %s2718_s1, %s1230_s11 }
  0x57   : > { %s1651_s24 = scalar_lea.hbm %s207_s20, 16  ;;  %p1654_p8 = scmp.lt.u32.totalorder %s207_s20, %s2718_s1 }
  0x58   : > { %p1652_p6 = scmp.ne.s32.totalorder %s207_s20, %s1651_s24  ;;  %p1655_p9 = scmp.lt.u32.totalorder %s2311_s21, %s1651_s24 }
  0x59   : > { %p1657_p12 = scmp.lt.u32.totalorder %s1651_s24, %s207_s20 }
  0x5a   : > { %p1656_p10 = por %p1655_p9, %p1654_p8 }
  0x5c   : > { %p1658_p1 = por %p1657_p12, %p1656_p10 }
  0x5e   : > { %p1659_p3 = pnand %p1658_p1, %p1652_p6 }
  0x60   : > { %1662 = shalt.err (!%p1659_p3)  }
  0x61   : > { %s1663_s16 = scalar_lea.vmem %s2291_s23, 16  ;;  %s2320_s11 = scalar_lea.vmem %s2291_s23, 512 }
  0x62   : > { %p1664_p5 = scmp.ne.s32.totalorder %s2291_s23, %s1663_s16  ;;  %p1668_p7 = scmp.lt.s32.totalorder %s2291_s23, %s2291_s23 }
  0x63   : > { %p1669_p11 = scmp.lt.s32.totalorder %s2320_s11, %s1663_s16 }
  0x65   : > { %p1670_p13 = por %p1669_p11, %p1668_p7 }
  0x67   : > { %p1671_p4 = pnand %p1670_p13, %p1664_p5 }
  0x69   : > { %1674 = shalt.err (!%p1671_p4)  }
  0x6a   : > { %218 = dma.hbm_to_vmem [thread:$0]  %s207_s20, 16, %s2291_s23, [#allocation3] }
  0x6b   : > { %s2765_s9 = smov (!%p1231_p0, %s222_s9), 31  ;;  %s2129_s13 = smov [#allocation2 + $0x2]  }
  0x6c   : > { %s242_s2 = scalar_select %p241_p2, %s2296_s0, 0 }
  0x6d   : > { %s1236_s10 = sshll.u32 %s2765_s9, 4  ;;  %s255_s18 = sshll.u32 %s2129_s13, 4  ;;  %s2334_s18 = int_to_ptr.vmem [resolvable:$true] %s255_s18 }
  0x6e   : > { %s226_s26 = scalar_lea.hbm %s2718_s1, %s1236_s10 }
  0x6f   : > { %s1675_s16 = scalar_lea.hbm %s226_s26, 16  ;;  %p1678_p6 = scmp.lt.u32.totalorder %s226_s26, %s2718_s1 }
  0x70   : > { %p1676_p4 = scmp.ne.s32.totalorder %s226_s26, %s1675_s16  ;;  %p1679_p8 = scmp.lt.u32.totalorder %s2311_s21, %s1675_s16 }
  0x71   : > { %p1681_p0 = scmp.lt.u32.totalorder %s1675_s16, %s226_s26 }
  0x72   : > { %p1680_p9 = por %p1679_p8, %p1678_p6 }
  0x74   : > { %p1682_p10 = por %p1681_p0, %p1680_p9 }
  0x76   : > { %p1683_p2 = pnand %p1682_p10, %p1676_p4 }
  0x78   : > { %1686 = shalt.err (!%p1683_p2)  }
  0x79   : > { %s1687_s17 = scalar_lea.vmem %s2298_s27, 16  ;;  %p1692_p1 = scmp.lt.s32.totalorder %s2298_s27, %s2291_s23 }
  0x7a   : > { %p1688_p12 = scmp.ne.s32.totalorder %s2298_s27, %s1687_s17  ;;  %p1693_p3 = scmp.lt.s32.totalorder %s2320_s11, %s1687_s17 }
  0x7c   : > { %p1694_p5 = por %p1693_p3, %p1692_p1 }
  0x7e   : > { %p1695_p7 = pnand %p1694_p5, %p1688_p12 }
  0x80   : > { %1698 = shalt.err (!%p1695_p7)  }
  0x81   : > { %238 = dma.hbm_to_vmem [thread:$0]  %s226_s26, 16, %s2298_s27, [#allocation3] }
  0x82   : > { %p2746_p11 = scmp.lt.s32.totalorder %s2296_s0, 31  ;;  %s259_s7 = sadd.s32 3, %s2283_s22 }
  0x83   : > { %s2349_s9 = sld [smem:[#allocation5 + %s259_s7]]  ;;  %s2130_s24 = smov [#allocation2 + $0x3]  }
  0x84   : > { %s2767_s2 = smov (!%p2746_p11, %s242_s2), 31  ;;  %s275_s25 = sshll.u32 %s2130_s24, 4  ;;  %s2364_s25 = int_to_ptr.vmem [resolvable:$true] %s275_s25 }
  0x85   : > { %s1242_s15 = sshll.u32 %s2767_s2, 4 }
  0x86   : > { %s246_s13 = scalar_lea.hbm %s2718_s1, %s1242_s15 }
  0x87   : > { %s1699_s16 = scalar_lea.hbm %s246_s13, 16  ;;  %p1702_p4 = scmp.lt.u32.totalorder %s246_s13, %s2718_s1 }
  0x88   : > { %p1700_p13 = scmp.ne.s32.totalorder %s246_s13, %s1699_s16  ;;  %p1703_p6 = scmp.lt.u32.totalorder %s2311_s21, %s1699_s16 }
  0x89   : > { %p1705_p9 = scmp.lt.u32.totalorder %s1699_s16, %s246_s13 }
  0x8a   : > { %p1704_p8 = por %p1703_p6, %p1702_p4 }
  0x8c   : > { %p1706_p0 = por %p1705_p9, %p1704_p8 }
  0x8e   : > { %p1707_p10 = pnand %p1706_p0, %p1700_p13 }
  0x90   : > { %1710 = shalt.err (!%p1707_p10)  }
  0x91   : > { %s1711_s27 = scalar_lea.vmem %s2334_s18, 16  ;;  %p1716_p12 = scmp.lt.s32.totalorder %s2334_s18, %s2291_s23 }
  0x92   : > { %p1712_p2 = scmp.ne.s32.totalorder %s2334_s18, %s1711_s27  ;;  %p1717_p1 = scmp.lt.s32.totalorder %s2320_s11, %s1711_s27 }
  0x94   : > { %p1718_p3 = por %p1717_p1, %p1716_p12 }
  0x96   : > { %p1719_p5 = pnand %p1718_p3, %p1712_p2 }
  0x98   : > { %1722 = shalt.err (!%p1719_p5)  }
  0x99   : > { %258 = dma.hbm_to_vmem [thread:$0]  %s246_s13, 16, %s2334_s18, [#allocation3] }
  0x9a   : > { %s279_s30 = sadd.s32 4, %s2283_s22  ;;  %s2131_s2 = smov [#allocation2 + $0x4]  }
  0x9b   : > { %s2367_s0 = sld [smem:[#allocation5 + %s279_s30]]  ;;  %s295_s26 = sshll.u32 %s2131_s2, 4  ;;  %s2372_s26 = int_to_ptr.vmem [resolvable:$true] %s295_s26 }
  0x9c   : > { %s299_s7 = sadd.s32 5, %s2283_s22  ;;  %p261_p7 = scmp.gt.s32.totalorder %s2349_s9, 0 }
  0x9d   : > { %p1243_p11 = scmp.lt.s32.totalorder %s2349_s9, 31  ;;  %s2374_s15 = sld [smem:[#allocation5 + %s299_s7]] }
  0x9e   : > { %s2769_s9 = smov (!%p261_p7, %s2349_s9), 0  ;;  %s319_s18 = sadd.s32 6, %s2283_s22 }
  0x9f   : > { %s2771_s9 = smov (!%p1243_p11, %s2769_s9), 31  ;;  %s2132_s10 = smov [#allocation2 + $0x5]  }
  0xa0   : > { %s1248_s20 = sshll.u32 %s2771_s9, 4  ;;  %s315_s13 = sshll.u32 %s2132_s10, 4  ;;  %s2403_s13 = int_to_ptr.vmem [resolvable:$true] %s315_s13 }
  0xa1   : > { %p281_p13 = scmp.gt.s32.totalorder %s2367_s0, 0  ;;  %s266_s17 = scalar_lea.hbm %s2718_s1, %s1248_s20 }
  0xa2   : > { %s1723_s27 = scalar_lea.hbm %s266_s17, 16  ;;  %p1726_p9 = scmp.lt.u32.totalorder %s266_s17, %s2718_s1 }
  0xa3   : > { %p301_p6 = scmp.gt.s32.totalorder %s2374_s15, 0  ;;  %p1724_p8 = scmp.ne.s32.totalorder %s266_s17, %s1723_s27 }
  0xa4   : > { %p1727_p0 = scmp.lt.u32.totalorder %s2311_s21, %s1723_s27  ;;  %p1729_p2 = scmp.lt.u32.totalorder %s1723_s27, %s266_s17 }
  0xa6   : > { %p1728_p10 = por %p1727_p0, %p1726_p9 }
  0xa8   : > { %p1730_p12 = por %p1729_p2, %p1728_p10 }
  0xaa   : > { %p1731_p1 = pnand %p1730_p12, %p1724_p8 }
  0xac   : > { %1734 = shalt.err (!%p1731_p1)  }
  0xad   : > { %s1735_s9 = scalar_lea.vmem %s2364_s25, 16  ;;  %p1740_p5 = scmp.lt.s32.totalorder %s2364_s25, %s2291_s23 }
  0xae   : > { %p1736_p3 = scmp.ne.s32.totalorder %s2364_s25, %s1735_s9  ;;  %p1741_p7 = scmp.lt.s32.totalorder %s2320_s11, %s1735_s9 }
  0xb0   : > { %p1742_p11 = por %p1741_p7, %p1740_p5 }
  0xb2   : > { %p1743_p4 = pnand %p1742_p11, %p1736_p3 }
  0xb4   : > { %1746 = shalt.err (!%p1743_p4)  }
  0xb5   : > { %278 = dma.hbm_to_vmem [thread:$0]  %s266_s17, 16, %s2364_s25, [#allocation3] }
  0xb6   : > { %s282_s7 = scalar_select %p281_p13, %s2367_s0, 0 }
  0xb7   : > { %s302_s20 = scalar_select %p301_p6, %s2374_s15, 0 }
  0xb8   : > { %p2747_p8 = scmp.lt.s32.totalorder %s2367_s0, 31  ;;  %p1255_p9 = scmp.lt.s32.totalorder %s2374_s15, 31 }
  0xb9   : > { %s2407_s24 = sld [smem:[#allocation5 + %s319_s18]] }
  0xba   : > { %s2773_s7 = smov (!%p2747_p8, %s282_s7), 31 }
  0xbb   : > { %s1254_s10 = sshll.u32 %s2773_s7, 4 }
  0xbc   : > { %s286_s30 = scalar_lea.hbm %s2718_s1, %s1254_s10 }
  0xbd   : > { %s1747_s2 = scalar_lea.hbm %s286_s30, 16  ;;  %p1750_p13 = scmp.lt.u32.totalorder %s286_s30, %s2718_s1 }
  0xbe   : > { %p1748_p4 = scmp.ne.s32.totalorder %s286_s30, %s1747_s2  ;;  %p1751_p6 = scmp.lt.u32.totalorder %s2311_s21, %s1747_s2 }
  0xbf   : > { %p1753_p10 = scmp.lt.u32.totalorder %s1747_s2, %s286_s30 }
  0xc0   : > { %p1752_p0 = por %p1751_p6, %p1750_p13 }
  0xc2   : > { %p1754_p2 = por %p1753_p10, %p1752_p0 }
  0xc4   : > { %p1755_p12 = pnand %p1754_p2, %p1748_p4 }
  0xc6   : > { %1758 = shalt.err (!%p1755_p12)  }
  0xc7   : > { %s1759_s0 = scalar_lea.vmem %s2372_s26, 16  ;;  %p1764_p3 = scmp.lt.s32.totalorder %s2372_s26, %s2291_s23 }
  0xc8   : > { %p1760_p1 = scmp.ne.s32.totalorder %s2372_s26, %s1759_s0  ;;  %p1765_p5 = scmp.lt.s32.totalorder %s2320_s11, %s1759_s0 }
  0xca   : > { %p1766_p7 = por %p1765_p5, %p1764_p3 }
  0xcc   : > { %p1767_p11 = pnand %p1766_p7, %p1760_p1 }
  0xce   : > { %1770 = shalt.err (!%p1767_p11)  }
  0xcf   : > { %298 = dma.hbm_to_vmem [thread:$0]  %s286_s30, 16, %s2372_s26, [#allocation3] }
  0xd0   : > { %s2775_s20 = smov (!%p1255_p9, %s302_s20), 31  ;;  %s2133_s18 = smov [#allocation2 + $0x6]  }
  0xd1   : > { %s335_s9 = sshll.u32 %s2133_s18, 4  ;;  %s339_s7 = sadd.s32 7, %s2283_s22  ;;  %s2425_s9 = int_to_ptr.vmem [resolvable:$true] %s335_s9 }
  0xd2   : > { %s1260_s10 = sshll.u32 %s2775_s20, 4  ;;  %p321_p8 = scmp.gt.s32.totalorder %s2407_s24, 0 }
  0xd3   : > { %s306_s2 = scalar_lea.hbm %s2718_s1, %s1260_s10 }
  0xd4   : > { %s1771_s25 = scalar_lea.hbm %s306_s2, 16  ;;  %p1774_p13 = scmp.lt.u32.totalorder %s306_s2, %s2718_s1 }
  0xd5   : > { %p1772_p4 = scmp.ne.s32.totalorder %s306_s2, %s1771_s25  ;;  %p1775_p6 = scmp.lt.u32.totalorder %s2311_s21, %s1771_s25 }
  0xd6   : > { %p1777_p9 = scmp.lt.u32.totalorder %s1771_s25, %s306_s2 }
  0xd7   : > { %p1776_p0 = por %p1775_p6, %p1774_p13 }
  0xd9   : > { %p1778_p10 = por %p1777_p9, %p1776_p0 }
  0xdb   : > { %p1779_p2 = pnand %p1778_p10, %p1772_p4 }
  0xdd   : > { %1782 = shalt.err (!%p1779_p2)  }
  0xde   : > { %s1783_s26 = scalar_lea.vmem %s2403_s13, 16  ;;  %p1788_p1 = scmp.lt.s32.totalorder %s2403_s13, %s2291_s23 }
  0xdf   : > { %p1784_p12 = scmp.ne.s32.totalorder %s2403_s13, %s1783_s26  ;;  %p1789_p3 = scmp.lt.s32.totalorder %s2320_s11, %s1783_s26 }
  0xe1   : > { %p1790_p5 = por %p1789_p3, %p1788_p1 }
  0xe3   : > { %p1791_p7 = pnand %p1790_p5, %p1784_p12 }
  0xe5   : > { %1794 = shalt.err (!%p1791_p7)  }
  0xe6   : > { %318 = dma.hbm_to_vmem [thread:$0]  %s306_s2, 16, %s2403_s13, [#allocation3] }
  0xe7   : > { %s322_s15 = scalar_select %p321_p8, %s2407_s24, 0 }
  0xe8   : > { %p1261_p11 = scmp.lt.s32.totalorder %s2407_s24, 31  ;;  %s2445_s20 = sld [smem:[#allocation5 + %s339_s7]] }
  0xe9   : > { %s359_s30 = sadd.s32 8, %s2283_s22  ;;  %s2134_s18 = smov [#allocation2 + $0x7]  }
  0xea   : > { %s2777_s15 = smov (!%p1261_p11, %s322_s15), 31  ;;  %s355_s10 = sshll.u32 %s2134_s18, 4  ;;  %s2450_s10 = int_to_ptr.vmem [resolvable:$true] %s355_s10 }
  0xeb   : > { %s2448_s16 = sld [smem:[#allocation5 + %s359_s30]]  ;;  %s1266_s27 = sshll.u32 %s2777_s15, 4 }
  0xec   : > { %s326_s0 = scalar_lea.hbm %s2718_s1, %s1266_s27 }
  0xed   : > { %s1795_s26 = scalar_lea.hbm %s326_s0, 16  ;;  %p1798_p8 = scmp.lt.u32.totalorder %s326_s0, %s2718_s1 }
  0xee   : > { %p1796_p4 = scmp.ne.s32.totalorder %s326_s0, %s1795_s26  ;;  %p1799_p13 = scmp.lt.u32.totalorder %s2311_s21, %s1795_s26 }
  0xef   : > { %p1801_p0 = scmp.lt.u32.totalorder %s1795_s26, %s326_s0 }
  0xf0   : > { %p1800_p6 = por %p1799_p13, %p1798_p8 }
  0xf2   : > { %p1802_p9 = por %p1801_p0, %p1800_p6 }
  0xf4   : > { %p1803_p10 = pnand %p1802_p9, %p1796_p4 }
  0xf6   : > { %1806 = shalt.err (!%p1803_p10)  }
  0xf7   : > { %s1807_s24 = scalar_lea.vmem %s2425_s9, 16  ;;  %p1812_p12 = scmp.lt.s32.totalorder %s2425_s9, %s2291_s23 }
  0xf8   : > { %p1808_p2 = scmp.ne.s32.totalorder %s2425_s9, %s1807_s24  ;;  %p1813_p1 = scmp.lt.s32.totalorder %s2320_s11, %s1807_s24 }
  0xfa   : > { %p1814_p3 = por %p1813_p1, %p1812_p12 }
  0xfc   : > { %p1815_p5 = pnand %p1814_p3, %p1808_p2 }
  0xfe   : > { %1818 = shalt.err (!%p1815_p5)  }
  0xff   : > { %338 = dma.hbm_to_vmem [thread:$0]  %s326_s0, 16, %s2425_s9, [#allocation3] }
 0x100   : > { %p341_p7 = scmp.gt.s32.totalorder %s2445_s20, 0  ;;  %p1267_p11 = scmp.lt.s32.totalorder %s2445_s20, 31 }
 0x101   : > { %s2135_s7 = smov [#allocation2 + $0x8]   ;;  %s379_s30 = sadd.s32 9, %s2283_s22 }
 0x102   : > { %s375_s15 = sshll.u32 %s2135_s7, 4  ;;  %s2779_s20 = smov (!%p341_p7, %s2445_s20), 0  ;;  %s2472_s15 = int_to_ptr.vmem [resolvable:$true] %s375_s15 }
 0x103   : > { %p361_p4 = scmp.gt.s32.totalorder %s2448_s16, 0  ;;  %p1273_p8 = scmp.lt.s32.totalorder %s2448_s16, 31 }
 0x104   : > { %s2781_s20 = smov (!%p1267_p11, %s2779_s20), 31  ;;  %s2477_s13 = sld [smem:[#allocation5 + %s379_s30]] }
 0x105   : > { %s362_s18 = scalar_select %p361_p4, %s2448_s16, 0 }
 0x106   : > { %s1272_s27 = sshll.u32 %s2781_s20, 4 }
 0x107   : > { %s346_s26 = scalar_lea.hbm %s2718_s1, %s1272_s27 }
 0x108   : > { %s1819_s9 = scalar_lea.hbm %s346_s26, 16  ;;  %p1822_p6 = scmp.lt.u32.totalorder %s346_s26, %s2718_s1 }
 0x109   : > { %p1820_p13 = scmp.ne.s32.totalorder %s346_s26, %s1819_s9  ;;  %p1823_p0 = scmp.lt.u32.totalorder %s2311_s21, %s1819_s9 }
 0x10a   : > { %p1825_p10 = scmp.lt.u32.totalorder %s1819_s9, %s346_s26 }
 0x10b   : > { %p1824_p9 = por %p1823_p0, %p1822_p6 }
 0x10d   : > { %p1826_p2 = por %p1825_p10, %p1824_p9 }
 0x10f   : > { %p1827_p12 = pnand %p1826_p2, %p1820_p13 }
 0x111   : > { %1830 = shalt.err (!%p1827_p12)  }
 0x112   : > { %s1831_s20 = scalar_lea.vmem %s2450_s10, 16  ;;  %p1836_p3 = scmp.lt.s32.totalorder %s2450_s10, %s2291_s23 }
 0x113   : > { %p1832_p1 = scmp.ne.s32.totalorder %s2450_s10, %s1831_s20  ;;  %p1837_p5 = scmp.lt.s32.totalorder %s2320_s11, %s1831_s20 }
 0x115   : > { %p1838_p7 = por %p1837_p5, %p1836_p3 }
 0x117   : > { %p1839_p11 = pnand %p1838_p7, %p1832_p1 }
 0x119   : > { %1842 = shalt.err (!%p1839_p11)  }
 0x11a   : > { %358 = dma.hbm_to_vmem [thread:$0]  %s346_s26, 16, %s2450_s10, [#allocation3] }
 0x11b   : > { %s2783_s18 = smov (!%p1273_p8, %s362_s18), 31  ;;  %s399_s24 = sadd.s32 10, %s2283_s22 }
 0x11c   : > { %s1278_s7 = sshll.u32 %s2783_s18, 4  ;;  %s2136_s30 = smov [#allocation2 + $0x9]  }
 0x11d   : > { %s395_s27 = sshll.u32 %s2136_s30, 4  ;;  %s366_s9 = scalar_lea.hbm %s2718_s1, %s1278_s7  ;;  %s2495_s27 = int_to_ptr.vmem [resolvable:$true] %s395_s27 }
 0x11e   : > { %s1843_s0 = scalar_lea.hbm %s366_s9, 16  ;;  %p1846_p13 = scmp.lt.u32.totalorder %s366_s9, %s2718_s1 }
 0x11f   : > { %p1844_p4 = scmp.ne.s32.totalorder %s366_s9, %s1843_s0  ;;  %p1847_p6 = scmp.lt.u32.totalorder %s2311_s21, %s1843_s0 }
 0x120   : > { %p1849_p9 = scmp.lt.u32.totalorder %s1843_s0, %s366_s9 }
 0x121   : > { %p1848_p0 = por %p1847_p6, %p1846_p13 }
 0x123   : > { %p1850_p8 = por %p1849_p9, %p1848_p0 }
 0x125   : > { %p1851_p10 = pnand %p1850_p8, %p1844_p4 }
 0x127   : > { %1854 = shalt.err (!%p1851_p10)  }
 0x128   : > { %s1855_s10 = scalar_lea.vmem %s2472_s15, 16  ;;  %p1860_p12 = scmp.lt.s32.totalorder %s2472_s15, %s2291_s23 }
 0x129   : > { %p1856_p2 = scmp.ne.s32.totalorder %s2472_s15, %s1855_s10  ;;  %p1861_p1 = scmp.lt.s32.totalorder %s2320_s11, %s1855_s10 }
 0x12b   : > { %p1862_p3 = por %p1861_p1, %p1860_p12 }
 0x12d   : > { %p1863_p5 = pnand %p1862_p3, %p1856_p2 }
 0x12f   : > { %1866 = shalt.err (!%p1863_p5)  }
 0x130   : > { %378 = dma.hbm_to_vmem [thread:$0]  %s366_s9, 16, %s2472_s15, [#allocation3] }
 0x131   : > { %p381_p7 = scmp.gt.s32.totalorder %s2477_s13, 0  ;;  %p1279_p11 = scmp.lt.s32.totalorder %s2477_s13, 31 }
 0x132   : > { %s2509_s16 = sld [smem:[#allocation5 + %s399_s24]]  ;;  %s2137_s18 = smov [#allocation2 + $0xa]  }
 0x133   : > { %s2785_s13 = smov (!%p381_p7, %s2477_s13), 0  ;;  %s415_s26 = sshll.u32 %s2137_s18, 4  ;;  %s2513_s26 = int_to_ptr.vmem [resolvable:$true] %s415_s26 }
 0x134   : > { %s419_s7 = sadd.s32 11, %s2283_s22  ;;  %s2787_s13 = smov (!%p1279_p11, %s2785_s13), 31 }
 0x135   : > { %s2515_s30 = sld [smem:[#allocation5 + %s419_s7]]  ;;  %s1284_s25 = sshll.u32 %s2787_s13, 4 }
 0x136   : > { %s386_s15 = scalar_lea.hbm %s2718_s1, %s1284_s25 }
 0x137   : > { %s1867_s9 = scalar_lea.hbm %s386_s15, 16  ;;  %p1870_p6 = scmp.lt.u32.totalorder %s386_s15, %s2718_s1 }
 0x138   : > { %p401_p4 = scmp.gt.s32.totalorder %s2509_s16, 0  ;;  %p1868_p13 = scmp.ne.s32.totalorder %s386_s15, %s1867_s9 }
 0x139   : > { %p1871_p0 = scmp.lt.u32.totalorder %s2311_s21, %s1867_s9  ;;  %p1873_p8 = scmp.lt.u32.totalorder %s1867_s9, %s386_s15 }
 0x13b   : > { %p1872_p9 = por %p1871_p0, %p1870_p6 }
 0x13d   : > { %p1874_p10 = por %p1873_p8, %p1872_p9 }
 0x13f   : > { %p1875_p2 = pnand %p1874_p10, %p1868_p13 }
 0x141   : > { %1878 = shalt.err (!%p1875_p2)  }
 0x142   : > { %s1879_s13 = scalar_lea.vmem %s2495_s27, 16  ;;  %p1884_p1 = scmp.lt.s32.totalorder %s2495_s27, %s2291_s23 }
 0x143   : > { %p1880_p12 = scmp.ne.s32.totalorder %s2495_s27, %s1879_s13  ;;  %p1885_p3 = scmp.lt.s32.totalorder %s2320_s11, %s1879_s13 }
 0x145   : > { %p1886_p5 = por %p1885_p3, %p1884_p1 }
 0x147   : > { %p1887_p7 = pnand %p1886_p5, %p1880_p12 }
 0x149   : > { %1890 = shalt.err (!%p1887_p7)  }
 0x14a   : > { %398 = dma.hbm_to_vmem [thread:$0]  %s386_s15, 16, %s2495_s27, [#allocation3] }
 0x14b   : > { %s402_s20 = scalar_select %p401_p4, %s2509_s16, 0 }
 0x14c   : > { %p1285_p11 = scmp.lt.s32.totalorder %s2509_s16, 31  ;;  %s2138_s10 = smov [#allocation2 + $0xb]  }
 0x14d   : > { %s435_s18 = sshll.u32 %s2138_s10, 4  ;;  %p421_p13 = scmp.gt.s32.totalorder %s2515_s30, 0  ;;  %s2538_s18 = int_to_ptr.vmem [resolvable:$true] %s435_s18 }
 0x14e   : > { %p1291_p6 = scmp.lt.s32.totalorder %s2515_s30, 31  ;;  %s2789_s20 = smov (!%p1285_p11, %s402_s20), 31 }
 0x14f   : > { %s422_s7 = scalar_select %p421_p13, %s2515_s30, 0 }
 0x150   : > { %s1290_s25 = sshll.u32 %s2789_s20, 4  ;;  %s439_s24 = sadd.s32 12, %s2283_s22 }
 0x151   : > { %s406_s9 = scalar_lea.hbm %s2718_s1, %s1290_s25 }
 0x152   : > { %s1891_s2 = scalar_lea.hbm %s406_s9, 16  ;;  %p1894_p4 = scmp.lt.u32.totalorder %s406_s9, %s2718_s1 }
 0x153   : > { %p1892_p0 = scmp.ne.s32.totalorder %s406_s9, %s1891_s2  ;;  %p1895_p9 = scmp.lt.u32.totalorder %s2311_s21, %s1891_s2 }
 0x154   : > { %p1897_p10 = scmp.lt.u32.totalorder %s1891_s2, %s406_s9 }
 0x155   : > { %p1896_p8 = por %p1895_p9, %p1894_p4 }
 0x157   : > { %p1898_p2 = por %p1897_p10, %p1896_p8 }
 0x159   : > { %p1899_p12 = pnand %p1898_p2, %p1892_p0 }
 0x15b   : > { %1902 = shalt.err (!%p1899_p12)  }
 0x15c   : > { %s1903_s16 = scalar_lea.vmem %s2513_s26, 16  ;;  %p1908_p3 = scmp.lt.s32.totalorder %s2513_s26, %s2291_s23 }
 0x15d   : > { %p1904_p1 = scmp.ne.s32.totalorder %s2513_s26, %s1903_s16  ;;  %p1909_p5 = scmp.lt.s32.totalorder %s2320_s11, %s1903_s16 }
 0x15f   : > { %p1910_p7 = por %p1909_p5, %p1908_p3 }
 0x161   : > { %p1911_p11 = pnand %p1910_p7, %p1904_p1 }
 0x163   : > { %1914 = shalt.err (!%p1911_p11)  }
 0x164   : > { %418 = dma.hbm_to_vmem [thread:$0]  %s406_s9, 16, %s2513_s26, [#allocation3] }
 0x165   : > { %s2791_s7 = smov (!%p1291_p6, %s422_s7), 31  ;;  %s2556_s13 = sld [smem:[#allocation5 + %s439_s24]] }
 0x166   : > { %s1296_s20 = sshll.u32 %s2791_s7, 4  ;;  %s2139_s0 = smov [#allocation2 + $0xc]  }
 0x167   : > { %s426_s17 = scalar_lea.hbm %s2718_s1, %s1296_s20  ;;  %s455_s2 = sshll.u32 %s2139_s0, 4  ;;  %s2572_s2 = int_to_ptr.vmem [resolvable:$true] %s455_s2 }
 0x168   : > { %s1915_s27 = scalar_lea.hbm %s426_s17, 16  ;;  %p1918_p0 = scmp.lt.u32.totalorder %s426_s17, %s2718_s1 }
 0x169   : > { %p1916_p13 = scmp.ne.s32.totalorder %s426_s17, %s1915_s27  ;;  %p1919_p4 = scmp.lt.u32.totalorder %s2311_s21, %s1915_s27 }
 0x16a   : > { %p1921_p8 = scmp.lt.u32.totalorder %s1915_s27, %s426_s17 }
 0x16b   : > { %p1920_p9 = por %p1919_p4, %p1918_p0 }
 0x16d   : > { %p1922_p10 = por %p1921_p8, %p1920_p9 }
 0x16f   : > { %p1923_p6 = pnand %p1922_p10, %p1916_p13 }
 0x171   : > { %1926 = shalt.err (!%p1923_p6)  }
 0x172   : > { %s1927_s26 = scalar_lea.vmem %s2538_s18, 16  ;;  %p1932_p12 = scmp.lt.s32.totalorder %s2538_s18, %s2291_s23 }
 0x173   : > { %p1928_p2 = scmp.ne.s32.totalorder %s2538_s18, %s1927_s26  ;;  %p1933_p1 = scmp.lt.s32.totalorder %s2320_s11, %s1927_s26 }
 0x175   : > { %p1934_p3 = por %p1933_p1, %p1932_p12 }
 0x177   : > { %p1935_p5 = pnand %p1934_p3, %p1928_p2 }
 0x179   : > { %1938 = shalt.err (!%p1935_p5)  }
 0x17a   : > { %438 = dma.hbm_to_vmem [thread:$0]  %s426_s17, 16, %s2538_s18, [#allocation3] }
 0x17b   : > { %s459_s30 = sadd.s32 13, %s2283_s22  ;;  %p441_p7 = scmp.gt.s32.totalorder %s2556_s13, 0 }
 0x17c   : > { %s2574_s7 = sld [smem:[#allocation5 + %s459_s30]]  ;;  %p1297_p11 = scmp.lt.s32.totalorder %s2556_s13, 31 }
 0x17d   : > { %s2140_s9 = smov [#allocation2 + $0xd]   ;;  %s479_s20 = sadd.s32 14, %s2283_s22 }
 0x17e   : > { %s475_s24 = sshll.u32 %s2140_s9, 4  ;;  %s2793_s13 = smov (!%p441_p7, %s2556_s13), 0  ;;  %s2583_s24 = int_to_ptr.vmem [resolvable:$true] %s475_s24 }
 0x17f   : > { %s2580_s10 = sld [smem:[#allocation5 + %s479_s20]]  ;;  %s2795_s13 = smov (!%p1297_p11, %s2793_s13), 31 }
 0x180   : > { %s1302_s18 = sshll.u32 %s2795_s13, 4  ;;  %s2141_s27 = smov [#allocation2 + $0xe]  }
 0x181   : > { %s446_s0 = scalar_lea.hbm %s2718_s1, %s1302_s18  ;;  %s2589_s15 = sshll.u32 %s2141_s27, 4  ;;  %s496_s15 = int_to_ptr.vmem [resolvable:$true] %s2589_s15 }
 0x182   : > { %p461_p13 = scmp.gt.s32.totalorder %s2574_s7, 0  ;;  %p1303_p0 = scmp.lt.s32.totalorder %s2574_s7, 31 }
 0x183   : > { %s1939_s16 = scalar_lea.hbm %s446_s0, 16  ;;  %p1942_p9 = scmp.lt.u32.totalorder %s446_s0, %s2718_s1 }
 0x184   : > { %p1940_p4 = scmp.ne.s32.totalorder %s446_s0, %s1939_s16  ;;  %p1943_p8 = scmp.lt.u32.totalorder %s2311_s21, %s1939_s16 }
 0x185   : > { %p1945_p6 = scmp.lt.u32.totalorder %s1939_s16, %s446_s0 }
 0x186   : > { %p1944_p10 = por %p1943_p8, %p1942_p9 }
 0x188   : > { %p1946_p2 = por %p1945_p6, %p1944_p10 }
 0x18a   : > { %p1947_p12 = pnand %p1946_p2, %p1940_p4 }
 0x18c   : > { %1950 = shalt.err (!%p1947_p12)  }
 0x18d   : > { %s1951_s13 = scalar_lea.vmem %s2572_s2, 16  ;;  %p1956_p3 = scmp.lt.s32.totalorder %s2572_s2, %s2291_s23 }
 0x18e   : > { %p1952_p1 = scmp.ne.s32.totalorder %s2572_s2, %s1951_s13  ;;  %p1957_p5 = scmp.lt.s32.totalorder %s2320_s11, %s1951_s13 }
 0x190   : > { %p1958_p7 = por %p1957_p5, %p1956_p3 }
 0x192   : > { %p1959_p11 = pnand %p1958_p7, %p1952_p1 }
 0x194   : > { %1962 = shalt.err (!%p1959_p11)  }
 0x195   : > { %458 = dma.hbm_to_vmem [thread:$0]  %s446_s0, 16, %s2572_s2, [#allocation3] }
 0x196   : > { %s462_s9 = scalar_select %p461_p13, %s2574_s7, 0 }
 0x197   : > { %p481_p4 = scmp.gt.s32.totalorder %s2580_s10, 0  ;;  %p1309_p9 = scmp.lt.s32.totalorder %s2580_s10, 31 }
 0x198   : > { %s2797_s9 = smov (!%p1303_p0, %s462_s9), 31  ;;  %s499_s25 = sadd.s32 15, %s2283_s22 }
 0x199   : > { %s482_s20 = scalar_select %p481_p4, %s2580_s10, 0 }
 0x19a   : > { %s1308_s18 = sshll.u32 %s2797_s9, 4  ;;  %s2613_s26 = sld [smem:[#allocation5 + %s499_s25]] }
 0x19b   : > { %s466_s16 = scalar_lea.hbm %s2718_s1, %s1308_s18 }
 0x19c   : > { %s1963_s30 = scalar_lea.hbm %s466_s16, 16  ;;  %p1966_p10 = scmp.lt.u32.totalorder %s466_s16, %s2718_s1 }
 0x19d   : > { %p1964_p8 = scmp.ne.s32.totalorder %s466_s16, %s1963_s30  ;;  %p1967_p13 = scmp.lt.u32.totalorder %s2311_s21, %s1963_s30 }
 0x19e   : > { %p1969_p2 = scmp.lt.u32.totalorder %s1963_s30, %s466_s16 }
 0x19f   : > { %p1968_p6 = por %p1967_p13, %p1966_p10 }
 0x1a1   : > { %p1970_p12 = por %p1969_p2, %p1968_p6 }
 0x1a3   : > { %p1971_p0 = pnand %p1970_p12, %p1964_p8 }
 0x1a5   : > { %1974 = shalt.err (!%p1971_p0)  }
 0x1a6   : > { %s1975_s22 = scalar_lea.vmem %s2583_s24, 16  ;;  %p1980_p3 = scmp.lt.s32.totalorder %s2583_s24, %s2291_s23 }
 0x1a7   : > { %p1976_p1 = scmp.ne.s32.totalorder %s2583_s24, %s1975_s22  ;;  %p1981_p5 = scmp.lt.s32.totalorder %s2320_s11, %s1975_s22 }
 0x1a9   : > { %p1982_p7 = por %p1981_p5, %p1980_p3 }
 0x1ab   : > { %p1983_p11 = pnand %p1982_p7, %p1976_p1 }
 0x1ad   : > { %1986 = shalt.err (!%p1983_p11)  }
 0x1ae   : > { %478 = dma.hbm_to_vmem [thread:$0]  %s466_s16, 16, %s2583_s24, [#allocation3] }
 0x1af   : > { %s2799_s20 = smov (!%p1309_p9, %s482_s20), 31 }
 0x1b0   : > { %s1314_s14 = sshll.u32 %s2799_s20, 4 }
 0x1b1   : > { %s486_s0 = scalar_lea.hbm %s2718_s1, %s1314_s14 }
 0x1b2   : > { %s1987_s9 = scalar_lea.hbm %s486_s0, 16  ;;  %p1990_p8 = scmp.lt.u32.totalorder %s486_s0, %s2718_s1 }
 0x1b3   : > { %p1988_p4 = scmp.ne.s32.totalorder %s486_s0, %s1987_s9  ;;  %p1991_p10 = scmp.lt.u32.totalorder %s2311_s21, %s1987_s9 }
 0x1b4   : > { %p1993_p6 = scmp.lt.u32.totalorder %s1987_s9, %s486_s0 }
 0x1b5   : > { %p1992_p13 = por %p1991_p10, %p1990_p8 }
 0x1b7   : > { %p1994_p2 = por %p1993_p6, %p1992_p13 }
 0x1b9   : > { %p1995_p12 = pnand %p1994_p2, %p1988_p4 }
 0x1bb   : > { %1998 = shalt.err (!%p1995_p12)  }
 0x1bc   : > { %s1999_s24 = scalar_lea.vmem %s496_s15, 16  ;;  %p2004_p0 = scmp.lt.s32.totalorder %s496_s15, %s2291_s23 }
 0x1bd   : > { %p2000_p9 = scmp.ne.s32.totalorder %s496_s15, %s1999_s24  ;;  %p2005_p1 = scmp.lt.s32.totalorder %s2320_s11, %s1999_s24 }
 0x1bf   : > { %p2006_p3 = por %p2005_p1, %p2004_p0 }
 0x1c1   : > { %p2007_p5 = pnand %p2006_p3, %p2000_p9 }
 0x1c3   : > { %2010 = shalt.err (!%p2007_p5)  }
 0x1c4   : > { %498 = dma.hbm_to_vmem [thread:$0]  %s486_s0, 16, %s496_s15, [#allocation3] }
 0x1c5   : > { %p501_p7 = scmp.gt.s32.totalorder %s2613_s26, 0  ;;  %p1315_p11 = scmp.lt.s32.totalorder %s2613_s26, 31 }
 0x1c6   : > { %s2142_s10 = smov [#allocation2 + $0xf]  }
 0x1c7   : > { %s515_s20 = sshll.u32 %s2142_s10, 4  ;;  %s2801_s26 = smov (!%p501_p7, %s2613_s26), 0  ;;  %s516_s20 = int_to_ptr.vmem [resolvable:$true] %s515_s20 }
 0x1c8   : > { %s2803_s26 = smov (!%p1315_p11, %s2801_s26), 31 }
 0x1c9   : > { %s1320_s17 = sshll.u32 %s2803_s26, 4 }
 0x1ca   : > { %s506_s30 = scalar_lea.hbm %s2718_s1, %s1320_s17 }
 0x1cb   : > { %s2011_s13 = scalar_lea.hbm %s506_s30, 16  ;;  %p2014_p8 = scmp.lt.u32.totalorder %s506_s30, %s2718_s1 }
 0x1cc   : > { %p2012_p4 = scmp.ne.s32.totalorder %s506_s30, %s2011_s13  ;;  %p2015_p10 = scmp.lt.u32.totalorder %s2311_s21, %s2011_s13 }
 0x1cd   : > { %p2017_p6 = scmp.lt.u32.totalorder %s2011_s13, %s506_s30 }
 0x1ce   : > { %p2016_p13 = por %p2015_p10, %p2014_p8 }
 0x1d0   : > { %p2018_p2 = por %p2017_p6, %p2016_p13 }
 0x1d2   : > { %p2019_p12 = pnand %p2018_p2, %p2012_p4 }
 0x1d4   : > { %2022 = shalt.err (!%p2019_p12)  }
 0x1d5   : > { %s2023_s14 = scalar_lea.vmem %s516_s20, 16  ;;  %p2028_p0 = scmp.lt.s32.totalorder %s516_s20, %s2291_s23 }
 0x1d6   : > { %p2024_p9 = scmp.ne.s32.totalorder %s516_s20, %s2023_s14  ;;  %p2029_p1 = scmp.lt.s32.totalorder %s2320_s11, %s2023_s14 }
 0x1d8   : > { %p2030_p3 = por %p2029_p1, %p2028_p0 }
 0x1da   : > { %p2031_p5 = pnand %p2030_p3, %p2024_p9 }
 0x1dc   : > { %2034 = shalt.err (!%p2031_p5)  }
 0x1dd   : > { %518 = dma.hbm_to_vmem [thread:$0]  %s506_s30, 16, %s516_s20, [#allocation3] }
 0x1de   : > { %s2650_s26 = scalar_lea.vmem [#allocation9], %s2287_s19 }
 0x1df   : > { %2093 = dma.done.wait [#allocation3], 256 }
 0x1e0   : > { %2094 = vsyncadd [#allocation3], 4294967040  ;;  %v994_v0 = vld [vmem:[#allocation2] sm:$0xff]  ;;  %v995_v2 = vld [vmem:[#allocation2 + $0x8] sm:$0xff]  ;;  %s1521_s2 = sshll.u32 %s2113_s6, 8  ;;  %s1059_s7 = sshll.u32 %s2650_s26, 4  ;;  %s2666_s7 = int_to_ptr.vmem [resolvable:$true] %s1059_s7 }
 0x1e1   : > { %v996_v1 = vld [vmem:[#allocation6] sm:$0xff]  ;;  %v997_v4 = vld [vmem:[#allocation6 + $0x8] sm:$0xff]  ;;  %s2664_s18 = scalar_lea.hbm %s2722_s5, %s1521_s2  ;;  %s2748_s25 = sand.u32 1, %s2105_s29  }
 0x1e2   : > { %v998_v3 = vadd.f32 %v996_v1, %v994_v0  ;;  %v999_v5 = vadd.f32 %v997_v4, %v995_v2  ;;  %v1448_v21 = vld [vmem:[%s2720_s3] ss:$0 sm:$0xff]  ;;  %s2671_s24 = scalar_lea.sflag [#allocation8], %s2748_s25  ;;  %s2035_s10 = scalar_lea.vmem %s2666_s7, 256 }
 0x1e3   : > { %v1449_v23 = vld [vmem:[%s2721_s4] ss:$0 sm:$0xff]  ;;  %p2036_p7 = scmp.ne.s32.totalorder %s2666_s7, %s2035_s10  ;;  %p2749_p11 = scmp.ne.s32.totalorder %s2736_s12, 0 }
 0x1e4   : > { %1000 = vadd.xlane.f32.xlu0 %v998_v3  ;;  %s2143_s6 = smov [#allocation9]  }
 0x1e5   : > { %p2037_p4 = pnand %p2036_p7, %p2749_p11  ;;  %s2039_s20 = sshll.u32 %s2143_s6, 4  ;;  %s2040_s20 = int_to_ptr.vmem [resolvable:$false] %s2039_s20 }
 0x1e6   : > { %s2041_s17 = scalar_lea.vmem %s2040_s20, 512  ;;  %p2042_p10 = scmp.lt.s32.totalorder %s2666_s7, %s2040_s20 }
 0x1e7   : > { %p2038_p8 = pneg %p2037_p4  ;;  %p2043_p13 = scmp.lt.s32.totalorder %s2041_s17, %s2035_s10 }
 0x1e8   : > { %1002 = vadd.xlane.f32.xlu0 %v999_v5 }
 0x1e9   : > { %p2044_p6 = por %p2043_p13, %p2042_p10 }
 0x1eb   : > { %p2045_p2 = pnand %p2044_p6, %p2038_p8 }
 0x271   : > { %v1001_v6 = vpop.xlane.xlu0 %1000 }
 0x272   : > { %v1005_v7 = vmul.f32 0.0078125, %v1001_v6 }
 0x274   : > { %v1007_v8 = vsub.f32 %v998_v3, %v1005_v7 }
 0x275   : > { %v1003_v9 = vpop.xlane.xlu0 %1002 }
 0x276   : > { %v1006_v10 = vmul.f32 0.0078125, %v1003_v9  ;;  %v1009_v11 = vmul.f32 %v1007_v8, %v1007_v8 }
 0x278   : > { %v1008_v12 = vsub.f32 %v999_v5, %v1006_v10  ;;  %1011 = vadd.xlane.f32.xlu1 %v1009_v11 }
 0x27a   : > { %v1010_v13 = vmul.f32 %v1008_v12, %v1008_v12 }
 0x27c   : > { %1013 = vadd.xlane.f32.xlu1 %v1010_v13 }
 0x305   : > { %v1012_v14 = vpop.xlane.xlu1 %1011 }
 0x306   : > { %v1015_v15 = vmul.f32 0.0078125, %v1012_v14 }
 0x308   : > { %v1017_v16 = vadd.f32 1e-05, %v1015_v15 }
 0x309   : > { %v1014_v17 = vpop.xlane.xlu1 %1013 }
 0x30a   : > { %1609 = vrsqrt.f32 %v1017_v16  ;;  %v1016_v18 = vmul.f32 0.0078125, %v1014_v17 }
 0x30c   : > { %v1018_v19 = vadd.f32 1e-05, %v1016_v18 }
 0x30e   : > { %1611 = vrsqrt.f32 %v1018_v19 }
 0x314   : > { %v1610_v20 = vpop.eup %1609 }
 0x315   : > { %v1021_v22 = vmul.f32 %v1610_v20, %v1007_v8 }
 0x317   : > { %v1030_v24 = vmul.f32 %v1448_v21, %v1021_v22 }
 0x318   : > { %v1612_v25 = vpop.eup %1611 }
 0x319   : > { %v1039_v26 = vadd.f32 %v1449_v23, %v1030_v24  ;;  %v1022_v27 = vmul.f32 %v1612_v25, %v1008_v12 }
 0x31b   : > { %1041 = vst [vmem:[%s2650_s26] sm:$0xff] %v1039_v26  ;;  %v1031_v28 = vmul.f32 %v1448_v21, %v1022_v27 }
 0x31d   : > { %v1040_v29 = vadd.f32 %v1449_v23, %v1031_v28 }
 0x31f   : > { %1042 = vst [vmem:[%s2650_s26 + $0x8] sm:$0xff] %v1040_v29 }
 0x320   : > { %2048 = shalt.err (!%p2045_p2)
}
 0x321   : > { %s2049_s27 = scalar_lea.hbm %s2664_s18, 256  ;;  %s2053_s13 = scalar_lea.hbm %s2722_s5, 512 }
 0x322   : > { %p2050_p12 = scmp.ne.s32.totalorder %s2664_s18, %s2049_s27  ;;  %p2054_p1 = scmp.lt.u32.totalorder %s2664_s18, %s2722_s5 }
 0x323   : > { %p2055_p3 = scmp.lt.u32.totalorder %s2053_s13, %s2049_s27  ;;  %p2057_p7 = scmp.lt.u32.totalorder %s2049_s27, %s2664_s18 }
 0x324   : > { %p2051_p9 = pnand %p2050_p12, %p2749_p11 }
 0x325   : > { %p2056_p5 = por %p2055_p3, %p2054_p1 }
 0x326   : > { %p2052_p0 = pneg %p2051_p9 }
 0x327   : > { %p2058_p4 = por %p2057_p7, %p2056_p5 }
 0x329   : > { %p2059_p8 = pnand %p2058_p4, %p2052_p0 }
 0x32b   : > { %2062 = shalt.err (!%p2059_p8)
}
 0x32c   : > { %s2144_s14 = smov 128   ;;  %s2145_s26 = smov 8  }
 0x32d   : > { %1526 = dma.vmem_to_hbm [thread:$0]  (%p2749_p11), %s2666_s7, 256, %s2664_s18, %s2671_s24, %s2144_s14, %s2144_s14, %s2145_s26  }
 0x32e PF: > { %s2750_s21 = sld [smem:[#allocation83_spill]]  ;;  %p1538_p10 = scmp.ge.s32.totalorder %s2121_s8, 2 }
 0x32f   : > { %s1074_s19 = sand.u32 1, %s2101_s28  }
 0x330   : > { %s1075_s23 = scalar_lea.sflag [#allocation8], %s1074_s19 }
 0x334   : > { %p2751_p13 = scmp.ne.s32.totalorder %s2750_s21, 0 }
 0x336   : > { %p1533_p6 = pnand %p1538_p10, %p2751_p13 }
 0x338   : > { %2096 = dma.done.wait (!%p1533_p6), %s1075_s23, 256  }
 0x339   : > { %2098 = vsyncadd (!%p1533_p6), %s1075_s23, 4294967040  ;;  %s23_s8 = sadd.s32 1, %s2121_s8   ;;  %s2752_s11 = sld [smem:[#allocation80_spill]] }
 0x33a   : > { %p20_p2 = scmp.ge.s32.totalorder %s23_s8, 4   ;;  %s2753_s30 = sld [smem:[#allocation84_spill]] }
 0x33b   : > { %s2754_s6 = sld [smem:[#allocation81_spill]]  ;;  %s2755_s7 = sld [smem:[#allocation82_spill]] }
 0x33c   : > { %s2756_s28 = smov %s2105_s29  ;;  %22 = sbr.rel (!%p20_p2) target bundleno = 17 (0x11), region = 273 }
 0x33f   : > { %s2757_s29 = smov %s2752_s11 }
 0x343   :  { %1080 = vsyncpa [#allocation7], 1 }
 0x344   :  { %1082 = vsyncpa [#allocation7 + $0x1], 1 }
 0x345   :  { %1083 = vsyncpa [#allocation8], 1 }
 0x346   :  { %1085 = vsyncpa [#allocation8 + $0x1], 1 }
 0x347   :  { %1086 = vsyncmov [#allocation3] }
 0x34a   :  { %s1087_s12 = vpop.sfrf %1086 }
 0x34b   :  { %p1455_p11 = scmp.ne.s32.totalorder %s1087_s12, 0 }
 0x34d   :  { %1091 = shalt.err (%p1455_p11)  }
 0x34e   :  { %1093 = vsyncmov [#allocation3 + $0x1] }
 0x351   :  { %s1094_s2 = vpop.sfrf %1093 }
 0x352   :  { %p1456_p12 = scmp.ne.s32.totalorder %s1094_s2, 0 }
 0x354   :  { %1098 = shalt.err (%p1456_p12)  }

</bundles_post_ra>
